<compile_context>
chip_gen: v7x
topology: tpu7x:2x2x1
jax: 0.10.0
libtpu: 0.0.40
codegen_flags: <defaults>
</compile_context>

<pallas_src>
import math
import functools

import jax
import jax.numpy as jnp
from jax import lax
from jax.experimental import pallas as pl
from jax.experimental.pallas import tpu as pltpu


# ----------------------------- kernel helpers -----------------------------

def _layer_norm(x, gamma, beta, eps=1e-5):
    mu = jnp.mean(x, axis=-1, keepdims=True)
    var = jnp.mean((x - mu) ** 2, axis=-1, keepdims=True)
    return (x - mu) * lax.rsqrt(var + eps) * gamma + beta


def _gelu_exact(x):
    # PyTorch nn.GELU() default = exact erf formulation.
    return 0.5 * x * (1.0 + lax.erf(x * (1.0 / math.sqrt(2.0))))


# ------------------------------- the kernel -------------------------------

def block_kernel(x_ref, bias_ref, lnb_ref,
                 wqkv_ref, bqkv_ref, wp_ref, wfc_ref, bfc_ref, wpr_ref,
                 out_ref, *, n_head):
    x = x_ref[...]                              # (B*T, C) f32 -- whole batch, rows flattened
    BT, C = x.shape
    hd = C // n_head

    lnb = lnb_ref[...]                          # (6, C): g1, be1, g2, be2, b_proj, b_mlp_proj
    g1, be1 = lnb[0:1, :], lnb[1:2, :]
    g2, be2 = lnb[2:3, :], lnb[3:4, :]
    b_proj, b_mlp = lnb[4:5, :], lnb[5:6, :]

    # ---------------- attention branch ----------------
    h = _layer_norm(x, g1, be1)
    # Fused QKV projection (1/sqrt(hd) already folded into the Q columns of wqkv/bqkv).
    qkv = jnp.dot(h, wqkv_ref[...], preferred_element_type=jnp.float32) + bqkv_ref[...]

    def heads(base):                            # (B*T, 3C) slab -> (n_head, B*T, hd)
        return jnp.stack(
            [qkv[:, base + i * hd: base + (i + 1) * hd] for i in range(n_head)], axis=0)

    qh, kh, vh = heads(0), heads(C), heads(2 * C)

    # Batched over heads.  Causal / key-padding / cross-batch blocking is one additive bias.
    att = jnp.einsum('hqd,hkd->hqk', qh, kh, preferred_element_type=jnp.float32)
    att = att + bias_ref[...]                   # (B*T, B*T) bias broadcast over heads
    att = att - jnp.max(att, axis=-1, keepdims=True)
    e = jnp.exp(att)
    p = e * pl.reciprocal(jnp.sum(e, axis=-1, keepdims=True), approx=True)
    yh = jnp.einsum('hqk,hkd->hqd', p, vh, preferred_element_type=jnp.float32)
    y = jnp.concatenate([yh[i] for i in range(n_head)], axis=-1)   # (B*T, C)

    y = jnp.dot(y, wp_ref[...], preferred_element_type=jnp.float32) + b_proj
    x1 = x + y                                  # attn_drop / resid_drop == identity (eval)

    # ------------------ MLP branch ---------------------
    h2 = _layer_norm(x1, g2, be2)
    m = jnp.dot(h2, wfc_ref[...], preferred_element_type=jnp.float32) + bfc_ref[...]
    m = _gelu_exact(m)
    m = jnp.dot(m, wpr_ref[...], preferred_element_type=jnp.float32) + b_mlp
    out_ref[...] = x1 + m                       # mlp dropout == identity (eval)


# ------------------------------ the wrapper --------------------------------

def min_gpt_block(x, mask, params, causal, n_head):
    B, T, C = x.shape
    BT = B * T
    hd = C // n_head
    scale = 1.0 / math.sqrt(hd)

    # Additive attention bias (B*T, B*T): 0 where attending is allowed, -1e30 elsewhere.
    # Encodes causal mask * key-padding mask * same-batch block-diagonal.
    comb = causal[None, :, :] * mask[:, None, :].astype(jnp.float32)      # (B, T, T)
    eye_b = jnp.eye(B, dtype=jnp.float32)
    allowed = jnp.einsum('bc,bij->bicj', eye_b, comb).reshape(BT, BT)
    attn_bias = jnp.where(allowed == 0.0, jnp.float32(-1e30), jnp.float32(0.0))

    # Fused QKV weight/bias (attention scale folded into the Q columns) + packed vectors.
    wqkv = jnp.concatenate([params["wq"] * scale, params["wk"], params["wv"]], axis=1)
    bqkv = jnp.concatenate([params["bq"] * scale, params["bk"], params["bv"]], axis=1)
    lnb = jnp.concatenate([params["g1"], params["be1"], params["g2"], params["be2"],
                           params["bp"], params["bpr"]], axis=0)          # (6, C)

    x2 = x.reshape(BT, C)

    def full(shape):
        return pl.BlockSpec(shape, lambda i: (0,) * len(shape))

    kernel = functools.partial(block_kernel, n_head=n_head)
    out = pl.pallas_call(
        kernel,
        out_shape=jax.ShapeDtypeStruct((BT, C), jnp.float32),
        grid_spec=pltpu.PrefetchScalarGridSpec(
            num_scalar_prefetch=0,
            grid=(1,),
            in_specs=[
                full((BT, C)),            # x (flattened batch)
                full((BT, BT)),           # additive attention bias
                full((6, C)),             # ln1/ln2 gamma+beta, attn-proj bias, mlp-proj bias
                full((C, 3 * C)),         # fused QKV weight
                full((1, 3 * C)),         # fused QKV bias
                full((C, C)),             # attention output-projection weight
                full((C, 4 * C)),         # mlp fc weight
                full((1, 4 * C)),         # mlp fc bias
                full((4 * C, C)),         # mlp proj weight
            ],
            out_specs=full((BT, C)),
        ),
        # TODO(synk): on v7x (2 TensorCores) a parallel batch axis / core_map split of the B*T
        # rows would keep both cores busy; at these tiny sizes a single core handles everything.
        compiler_params=pltpu.CompilerParams(dimension_semantics=("arbitrary",)),
    )(x2, attn_bias, lnb, wqkv, bqkv, params["wp"], params["wfc"], params["bfc"], params["wpr"])
    return out.reshape(B, T, C), mask


# --------------------------- pure-JAX reference -----------------------------

def ref_block(x, mask, p, causal, n_head):
    def ln(v, g, b):
        mu = jnp.mean(v, -1, keepdims=True)
        var = jnp.mean((v - mu) ** 2, -1, keepdims=True)
        return (v - mu) / jnp.sqrt(var + 1e-5) * g + b

    B, T, C = x.shape
    hd = C // n_head
    h = ln(x, p["g1"], p["be1"])
    q = h @ p["wq"] + p["bq"]
    k = h @ p["wk"] + p["bk"]
    v = h @ p["wv"] + p["bv"]
    qh = q.reshape(B, T, n_head, hd).transpose(0, 2, 1, 3)
    kh = k.reshape(B, T, n_head, hd).transpose(0, 2, 1, 3)
    vh = v.reshape(B, T, n_head, hd).transpose(0, 2, 1, 3)
    att = (qh @ kh.transpose(0, 1, 3, 2)) * (1.0 / math.sqrt(hd))
    comb = causal[None, None, :, :] * mask[:, None, None, :]
    att = jnp.where(comb == 0.0, -jnp.inf, att)
    att = jax.nn.softmax(att, axis=-1)
    y = (att @ vh).transpose(0, 2, 1, 3).reshape(B, T, C)
    y = y @ p["wp"] + p["bp"]
    x1 = x + y
    h2 = ln(x1, p["g2"], p["be2"])
    m = jax.nn.gelu(h2 @ p["wfc"] + p["bfc"], approximate=False)
    return x1 + (m @ p["wpr"] + p["bpr"])


def make_causal_mask(num_frames, num_animals):
    a = jnp.tril(jnp.ones((num_frames, num_frames), jnp.float32))
    m = a[:, None, :, None] * jnp.ones((1, num_animals, 1, num_animals), jnp.float32)
    T = num_frames * num_animals
    return m.reshape(T, T)


# --------------------------------- main -------------------------------------

if __name__ == "__main__":
    num_frames, num_animals = 8, 2
    B, n_embd, n_head = 2, 32, 4
    T = num_frames * num_animals

    key = jax.random.PRNGKey(0)
    ks = jax.random.split(key, 20)

    def w(k, shape, s=0.05):
        return (s * jax.random.normal(k, shape)).astype(jnp.float32)

    params = {
        "g1": 1.0 + w(ks[0], (1, n_embd)), "be1": w(ks[1], (1, n_embd)),
        "g2": 1.0 + w(ks[2], (1, n_embd)), "be2": w(ks[3], (1, n_embd)),
        "wq": w(ks[4], (n_embd, n_embd)), "bq": w(ks[5], (1, n_embd)),
        "wk": w(ks[6], (n_embd, n_embd)), "bk": w(ks[7], (1, n_embd)),
        "wv": w(ks[8], (n_embd, n_embd)), "bv": w(ks[9], (1, n_embd)),
        "wp": w(ks[10], (n_embd, n_embd)), "bp": w(ks[11], (1, n_embd)),
        "wfc": w(ks[12], (n_embd, 4 * n_embd)), "bfc": w(ks[13], (1, 4 * n_embd)),
        "wpr": w(ks[14], (4 * n_embd, n_embd)), "bpr": w(ks[15], (1, n_embd)),
    }

    x = jax.random.normal(ks[16], (B, T, n_embd), jnp.float32)
    mask = jnp.ones((B, T), jnp.float32).at[:, -3:].set(0.0)   # pad out last 3 tokens
    causal = make_causal_mask(num_frames, num_animals)

    # TODO(synk): dropout (attn_pdrop / resid_pdrop) is treated as identity (inference mode).
    out, mask_out = min_gpt_block(x, mask, params, causal, n_head)
    out = jax.block_until_ready(out)

    ref = ref_block(x, mask, params, causal, n_head)
    assert out.shape == (B, T, n_embd)
    assert jnp.allclose(out, ref, rtol=2e-3, atol=2e-3), float(jnp.max(jnp.abs(out - ref)))

    print("KERNEL_OK")
</pallas_src>

<mosaic_0001>
module attributes {stable_mosaic.version = 11 : i64} {
  func.func @block_kernel(%arg0: i32, %arg1: memref<32x32xf32, #tpu.memory_space<vmem>>, %arg2: memref<32x32xf32, #tpu.memory_space<vmem>>, %arg3: memref<6x32xf32, #tpu.memory_space<vmem>>, %arg4: memref<32x96xf32, #tpu.memory_space<vmem>>, %arg5: memref<1x96xf32, #tpu.memory_space<vmem>>, %arg6: memref<32x32xf32, #tpu.memory_space<vmem>>, %arg7: memref<32x128xf32, #tpu.memory_space<vmem>>, %arg8: memref<1x128xf32, #tpu.memory_space<vmem>>, %arg9: memref<128x32xf32, #tpu.memory_space<vmem>>, %arg10: memref<32x32xf32, #tpu.memory_space<vmem>>) attributes {dimension_semantics = [#tpu.dimension_semantics<arbitrary>], iteration_bounds = array<i64: 1>, scalar_prefetch = 0 : i64, scratch_operands = 0 : i64, tpu.core_type = #tpu.core_type<tc>, window_params = [{pipeline_mode = #tpu.pipeline_mode<synchronous>, transform_indices = @transform_0, window_bounds = array<i64: 32, 32>}, {pipeline_mode = #tpu.pipeline_mode<synchronous>, transform_indices = @transform_1, window_bounds = array<i64: 32, 32>}, {pipeline_mode = #tpu.pipeline_mode<synchronous>, transform_indices = @transform_2, window_bounds = array<i64: 6, 32>}, {pipeline_mode = #tpu.pipeline_mode<synchronous>, transform_indices = @transform_3, window_bounds = array<i64: 32, 96>}, {pipeline_mode = #tpu.pipeline_mode<synchronous>, transform_indices = @transform_4, window_bounds = array<i64: 1, 96>}, {pipeline_mode = #tpu.pipeline_mode<synchronous>, transform_indices = @transform_5, window_bounds = array<i64: 32, 32>}, {pipeline_mode = #tpu.pipeline_mode<synchronous>, transform_indices = @transform_6, window_bounds = array<i64: 32, 128>}, {pipeline_mode = #tpu.pipeline_mode<synchronous>, transform_indices = @transform_7, window_bounds = array<i64: 1, 128>}, {pipeline_mode = #tpu.pipeline_mode<synchronous>, transform_indices = @transform_8, window_bounds = array<i64: 128, 32>}, {pipeline_mode = #tpu.pipeline_mode<synchronous>, transform_indices = @transform_9, window_bounds = array<i64: 32, 32>}]} {
    %c0 = arith.constant 0 : index
    %c0_0 = arith.constant 0 : index
    %0 = vector.load %arg1[%c0, %c0_0] : memref<32x32xf32, #tpu.memory_space<vmem>>, vector<32x32xf32>
    %c0_1 = arith.constant 0 : index
    %c0_2 = arith.constant 0 : index
    %1 = vector.load %arg3[%c0_1, %c0_2] : memref<6x32xf32, #tpu.memory_space<vmem>>, vector<6x32xf32>
    %2 = vector.extract_strided_slice %1 {offsets = [0, 0], sizes = [1, 32], strides = [1, 1]} : vector<6x32xf32> to vector<1x32xf32>
    %3 = vector.extract_strided_slice %1 {offsets = [1, 0], sizes = [1, 32], strides = [1, 1]} : vector<6x32xf32> to vector<1x32xf32>
    %4 = vector.extract_strided_slice %1 {offsets = [2, 0], sizes = [1, 32], strides = [1, 1]} : vector<6x32xf32> to vector<1x32xf32>
    %5 = vector.extract_strided_slice %1 {offsets = [3, 0], sizes = [1, 32], strides = [1, 1]} : vector<6x32xf32> to vector<1x32xf32>
    %6 = vector.extract_strided_slice %1 {offsets = [4, 0], sizes = [1, 32], strides = [1, 1]} : vector<6x32xf32> to vector<1x32xf32>
    %7 = vector.extract_strided_slice %1 {offsets = [5, 0], sizes = [1, 32], strides = [1, 1]} : vector<6x32xf32> to vector<1x32xf32>
    %cst = arith.constant dense<0.000000e+00> : vector<32xf32>
    %8 = vector.multi_reduction <add>, %0, %cst [1] : vector<32x32xf32> to vector<32xf32>
    %9 = vector.shape_cast %8 : vector<32xf32> to vector<32x1xf32>
    %cst_3 = arith.constant 3.200000e+01 : f32
    %10 = vector.broadcast %cst_3 : f32 to vector<32x1xf32>
    %11 = arith.divf %9, %10 : vector<32x1xf32>
    %12 = vector.broadcast %11 : vector<32x1xf32> to vector<32x32xf32>
    %13 = arith.subf %0, %12 : vector<32x32xf32>
    %14 = arith.mulf %13, %13 : vector<32x32xf32>
    %cst_4 = arith.constant dense<0.000000e+00> : vector<32xf32>
    %15 = vector.multi_reduction <add>, %14, %cst_4 [1] : vector<32x32xf32> to vector<32xf32>
    %16 = vector.shape_cast %15 : vector<32xf32> to vector<32x1xf32>
    %cst_5 = arith.constant 3.200000e+01 : f32
    %17 = vector.broadcast %cst_5 : f32 to vector<32x1xf32>
    %18 = arith.divf %16, %17 : vector<32x1xf32>
    %19 = vector.broadcast %11 : vector<32x1xf32> to vector<32x32xf32>
    %20 = arith.subf %0, %19 : vector<32x32xf32>
    %cst_6 = arith.constant 9.99999974E-6 : f32
    %21 = vector.broadcast %cst_6 : f32 to vector<32x1xf32>
    %22 = arith.addf %18, %21 : vector<32x1xf32>
    %23 = math.rsqrt %22 : vector<32x1xf32>
    %24 = vector.broadcast %23 : vector<32x1xf32> to vector<32x32xf32>
    %25 = arith.mulf %20, %24 : vector<32x32xf32>
    %26 = vector.broadcast %2 : vector<1x32xf32> to vector<32x32xf32>
    %27 = arith.mulf %25, %26 : vector<32x32xf32>
    %28 = vector.broadcast %3 : vector<1x32xf32> to vector<32x32xf32>
    %29 = arith.addf %27, %28 : vector<32x32xf32>
    %c0_7 = arith.constant 0 : index
    %c0_8 = arith.constant 0 : index
    %30 = vector.load %arg4[%c0_7, %c0_8] : memref<32x96xf32, #tpu.memory_space<vmem>>, vector<32x96xf32>
    %cst_9 = arith.constant dense<0.000000e+00> : vector<32x96xf32>
    %31 = tpu.matmul %29, %30, %cst_9 {dimension_numbers = #tpu.dot_dimension_numbers<[1], [0], [0], [1], [0, 0, 1, 1], [], []>} : vector<32x32xf32>, vector<32x96xf32>, vector<32x96xf32> -> vector<32x96xf32>
    %c0_10 = arith.constant 0 : index
    %c0_11 = arith.constant 0 : index
    %32 = vector.load %arg5[%c0_10, %c0_11] : memref<1x96xf32, #tpu.memory_space<vmem>>, vector<1x96xf32>
    %33 = vector.broadcast %32 : vector<1x96xf32> to vector<32x96xf32>
    %34 = arith.addf %31, %33 : vector<32x96xf32>
    %35 = vector.extract_strided_slice %34 {offsets = [0, 0], sizes = [32, 8], strides = [1, 1]} : vector<32x96xf32> to vector<32x8xf32>
    %36 = vector.extract_strided_slice %34 {offsets = [0, 8], sizes = [32, 8], strides = [1, 1]} : vector<32x96xf32> to vector<32x8xf32>
    %37 = vector.extract_strided_slice %34 {offsets = [0, 16], sizes = [32, 8], strides = [1, 1]} : vector<32x96xf32> to vector<32x8xf32>
    %38 = vector.extract_strided_slice %34 {offsets = [0, 24], sizes = [32, 8], strides = [1, 1]} : vector<32x96xf32> to vector<32x8xf32>
    %39 = vector.shape_cast %35 : vector<32x8xf32> to vector<1x32x8xf32>
    %40 = vector.shape_cast %36 : vector<32x8xf32> to vector<1x32x8xf32>
    %41 = vector.shape_cast %37 : vector<32x8xf32> to vector<1x32x8xf32>
    %42 = vector.shape_cast %38 : vector<32x8xf32> to vector<1x32x8xf32>
    %43 = tpu.concatenate %39, %40, %41, %42 in 0 : vector<1x32x8xf32>, vector<1x32x8xf32>, vector<1x32x8xf32>, vector<1x32x8xf32> -> vector<4x32x8xf32>
    %44 = vector.extract_strided_slice %34 {offsets = [0, 32], sizes = [32, 8], strides = [1, 1]} : vector<32x96xf32> to vector<32x8xf32>
    %45 = vector.extract_strided_slice %34 {offsets = [0, 40], sizes = [32, 8], strides = [1, 1]} : vector<32x96xf32> to vector<32x8xf32>
    %46 = vector.extract_strided_slice %34 {offsets = [0, 48], sizes = [32, 8], strides = [1, 1]} : vector<32x96xf32> to vector<32x8xf32>
    %47 = vector.extract_strided_slice %34 {offsets = [0, 56], sizes = [32, 8], strides = [1, 1]} : vector<32x96xf32> to vector<32x8xf32>
    %48 = vector.shape_cast %44 : vector<32x8xf32> to vector<1x32x8xf32>
    %49 = vector.shape_cast %45 : vector<32x8xf32> to vector<1x32x8xf32>
    %50 = vector.shape_cast %46 : vector<32x8xf32> to vector<1x32x8xf32>
    %51 = vector.shape_cast %47 : vector<32x8xf32> to vector<1x32x8xf32>
    %52 = tpu.concatenate %48, %49, %50, %51 in 0 : vector<1x32x8xf32>, vector<1x32x8xf32>, vector<1x32x8xf32>, vector<1x32x8xf32> -> vector<4x32x8xf32>
    %53 = vector.extract_strided_slice %34 {offsets = [0, 64], sizes = [32, 8], strides = [1, 1]} : vector<32x96xf32> to vector<32x8xf32>
    %54 = vector.extract_strided_slice %34 {offsets = [0, 72], sizes = [32, 8], strides = [1, 1]} : vector<32x96xf32> to vector<32x8xf32>
    %55 = vector.extract_strided_slice %34 {offsets = [0, 80], sizes = [32, 8], strides = [1, 1]} : vector<32x96xf32> to vector<32x8xf32>
    %56 = vector.extract_strided_slice %34 {offsets = [0, 88], sizes = [32, 8], strides = [1, 1]} : vector<32x96xf32> to vector<32x8xf32>
    %57 = vector.shape_cast %53 : vector<32x8xf32> to vector<1x32x8xf32>
    %58 = vector.shape_cast %54 : vector<32x8xf32> to vector<1x32x8xf32>
    %59 = vector.shape_cast %55 : vector<32x8xf32> to vector<1x32x8xf32>
    %60 = vector.shape_cast %56 : vector<32x8xf32> to vector<1x32x8xf32>
    %61 = tpu.concatenate %57, %58, %59, %60 in 0 : vector<1x32x8xf32>, vector<1x32x8xf32>, vector<1x32x8xf32>, vector<1x32x8xf32> -> vector<4x32x8xf32>
    "tpu.trace_start"() <{level = 10 : i32, message = "hqd,hkd->hqk"}> : () -> ()
    %cst_12 = arith.constant dense<0.000000e+00> : vector<4x32x32xf32>
    %62 = tpu.matmul %43, %52, %cst_12 {dimension_numbers = #tpu.dot_dimension_numbers<[2], [2], [1], [1], [0, 0, 0, 1, 1, 1], [0], [0]>} : vector<4x32x8xf32>, vector<4x32x8xf32>, vector<4x32x32xf32> -> vector<4x32x32xf32>
    "tpu.trace_stop"() : () -> ()
    %c0_13 = arith.constant 0 : index
    %c0_14 = arith.constant 0 : index
    %63 = vector.load %arg2[%c0_13, %c0_14] : memref<32x32xf32, #tpu.memory_space<vmem>>, vector<32x32xf32>
    %64 = vector.shape_cast %63 : vector<32x32xf32> to vector<1x32x32xf32>
    %65 = vector.broadcast %64 : vector<1x32x32xf32> to vector<4x32x32xf32>
    %66 = arith.addf %62, %65 : vector<4x32x32xf32>
    %cst_15 = arith.constant dense<0xFF800000> : vector<4x32xf32>
    %67 = vector.multi_reduction <maximumf>, %66, %cst_15 [2] : vector<4x32x32xf32> to vector<4x32xf32>
    %68 = vector.shape_cast %67 : vector<4x32xf32> to vector<4x32x1xf32>
    %69 = vector.broadcast %68 : vector<4x32x1xf32> to vector<4x32x32xf32>
    %70 = arith.subf %66, %69 : vector<4x32x32xf32>
    %71 = math.exp %70 : vector<4x32x32xf32>
    %cst_16 = arith.constant dense<0.000000e+00> : vector<4x32xf32>
    %72 = vector.multi_reduction <add>, %71, %cst_16 [2] : vector<4x32x32xf32> to vector<4x32xf32>
    %73 = vector.shape_cast %72 : vector<4x32xf32> to vector<4x32x1xf32>
    %74 = tpu.reciprocal %73 {approx = true} : vector<4x32x1xf32> -> vector<4x32x1xf32>
    %75 = vector.broadcast %74 : vector<4x32x1xf32> to vector<4x32x32xf32>
    %76 = arith.mulf %71, %75 : vector<4x32x32xf32>
    "tpu.trace_start"() <{level = 10 : i32, message = "hqk,hkd->hqd"}> : () -> ()
    %cst_17 = arith.constant dense<0.000000e+00> : vector<4x32x8xf32>
    %77 = tpu.matmul %76, %61, %cst_17 {dimension_numbers = #tpu.dot_dimension_numbers<[2], [1], [1], [2], [0, 0, 0, 1, 1, 2], [0], [0]>} : vector<4x32x32xf32>, vector<4x32x8xf32>, vector<4x32x8xf32> -> vector<4x32x8xf32>
    "tpu.trace_stop"() : () -> ()
    %78 = vector.extract_strided_slice %77 {offsets = [0, 0, 0], sizes = [1, 32, 8], strides = [1, 1, 1]} : vector<4x32x8xf32> to vector<1x32x8xf32>
    %79 = vector.shape_cast %78 : vector<1x32x8xf32> to vector<32x8xf32>
    %80 = vector.extract_strided_slice %77 {offsets = [1, 0, 0], sizes = [1, 32, 8], strides = [1, 1, 1]} : vector<4x32x8xf32> to vector<1x32x8xf32>
    %81 = vector.shape_cast %80 : vector<1x32x8xf32> to vector<32x8xf32>
    %82 = vector.extract_strided_slice %77 {offsets = [2, 0, 0], sizes = [1, 32, 8], strides = [1, 1, 1]} : vector<4x32x8xf32> to vector<1x32x8xf32>
    %83 = vector.shape_cast %82 : vector<1x32x8xf32> to vector<32x8xf32>
    %84 = vector.extract_strided_slice %77 {offsets = [3, 0, 0], sizes = [1, 32, 8], strides = [1, 1, 1]} : vector<4x32x8xf32> to vector<1x32x8xf32>
    %85 = vector.shape_cast %84 : vector<1x32x8xf32> to vector<32x8xf32>
    %86 = tpu.concatenate %79, %81, %83, %85 in 1 : vector<32x8xf32>, vector<32x8xf32>, vector<32x8xf32>, vector<32x8xf32> -> vector<32x32xf32>
    %c0_18 = arith.constant 0 : index
    %c0_19 = arith.constant 0 : index
    %87 = vector.load %arg6[%c0_18, %c0_19] : memref<32x32xf32, #tpu.memory_space<vmem>>, vector<32x32xf32>
    %cst_20 = arith.constant dense<0.000000e+00> : vector<32x32xf32>
    %88 = tpu.matmul %86, %87, %cst_20 {dimension_numbers = #tpu.dot_dimension_numbers<[1], [0], [0], [1], [0, 0, 1, 1], [], []>} : vector<32x32xf32>, vector<32x32xf32>, vector<32x32xf32> -> vector<32x32xf32>
    %89 = vector.broadcast %6 : vector<1x32xf32> to vector<32x32xf32>
    %90 = arith.addf %88, %89 : vector<32x32xf32>
    %91 = arith.addf %0, %90 : vector<32x32xf32>
    %cst_21 = arith.constant dense<0.000000e+00> : vector<32xf32>
    %92 = vector.multi_reduction <add>, %91, %cst_21 [1] : vector<32x32xf32> to vector<32xf32>
    %93 = vector.shape_cast %92 : vector<32xf32> to vector<32x1xf32>
    %cst_22 = arith.constant 3.200000e+01 : f32
    %94 = vector.broadcast %cst_22 : f32 to vector<32x1xf32>
    %95 = arith.divf %93, %94 : vector<32x1xf32>
    %96 = vector.broadcast %95 : vector<32x1xf32> to vector<32x32xf32>
    %97 = arith.subf %91, %96 : vector<32x32xf32>
    %98 = arith.mulf %97, %97 : vector<32x32xf32>
    %cst_23 = arith.constant dense<0.000000e+00> : vector<32xf32>
    %99 = vector.multi_reduction <add>, %98, %cst_23 [1] : vector<32x32xf32> to vector<32xf32>
    %100 = vector.shape_cast %99 : vector<32xf32> to vector<32x1xf32>
    %cst_24 = arith.constant 3.200000e+01 : f32
    %101 = vector.broadcast %cst_24 : f32 to vector<32x1xf32>
    %102 = arith.divf %100, %101 : vector<32x1xf32>
    %103 = vector.broadcast %95 : vector<32x1xf32> to vector<32x32xf32>
    %104 = arith.subf %91, %103 : vector<32x32xf32>
    %cst_25 = arith.constant 9.99999974E-6 : f32
    %105 = vector.broadcast %cst_25 : f32 to vector<32x1xf32>
    %106 = arith.addf %102, %105 : vector<32x1xf32>
    %107 = math.rsqrt %106 : vector<32x1xf32>
    %108 = vector.broadcast %107 : vector<32x1xf32> to vector<32x32xf32>
    %109 = arith.mulf %104, %108 : vector<32x32xf32>
    %110 = vector.broadcast %4 : vector<1x32xf32> to vector<32x32xf32>
    %111 = arith.mulf %109, %110 : vector<32x32xf32>
    %112 = vector.broadcast %5 : vector<1x32xf32> to vector<32x32xf32>
    %113 = arith.addf %111, %112 : vector<32x32xf32>
    %c0_26 = arith.constant 0 : index
    %c0_27 = arith.constant 0 : index
    %114 = vector.load %arg7[%c0_26, %c0_27] : memref<32x128xf32, #tpu.memory_space<vmem>>, vector<32x128xf32>
    %cst_28 = arith.constant dense<0.000000e+00> : vector<32x128xf32>
    %115 = tpu.matmul %113, %114, %cst_28 {dimension_numbers = #tpu.dot_dimension_numbers<[1], [0], [0], [1], [0, 0, 1, 1], [], []>} : vector<32x32xf32>, vector<32x128xf32>, vector<32x128xf32> -> vector<32x128xf32>
    %c0_29 = arith.constant 0 : index
    %c0_30 = arith.constant 0 : index
    %116 = vector.load %arg8[%c0_29, %c0_30] : memref<1x128xf32, #tpu.memory_space<vmem>>, vector<1x128xf32>
    %117 = vector.broadcast %116 : vector<1x128xf32> to vector<32x128xf32>
    %118 = arith.addf %115, %117 : vector<32x128xf32>
    %cst_31 = arith.constant 5.000000e-01 : f32
    %119 = vector.broadcast %cst_31 : f32 to vector<32x128xf32>
    %120 = arith.mulf %119, %118 : vector<32x128xf32>
    %cst_32 = arith.constant 0.707106769 : f32
    %121 = vector.broadcast %cst_32 : f32 to vector<32x128xf32>
    %122 = arith.mulf %118, %121 : vector<32x128xf32>
    %123 = math.erf %122 : vector<32x128xf32>
    %cst_33 = arith.constant 1.000000e+00 : f32
    %124 = vector.broadcast %cst_33 : f32 to vector<32x128xf32>
    %125 = arith.addf %124, %123 : vector<32x128xf32>
    %126 = arith.mulf %120, %125 : vector<32x128xf32>
    %c0_34 = arith.constant 0 : index
    %c0_35 = arith.constant 0 : index
    %127 = vector.load %arg9[%c0_34, %c0_35] : memref<128x32xf32, #tpu.memory_space<vmem>>, vector<128x32xf32>
    %cst_36 = arith.constant dense<0.000000e+00> : vector<32x32xf32>
    %128 = tpu.matmul %126, %127, %cst_36 {dimension_numbers = #tpu.dot_dimension_numbers<[1], [0], [0], [1], [0, 0, 1, 1], [], []>} : vector<32x128xf32>, vector<128x32xf32>, vector<32x32xf32> -> vector<32x32xf32>
    %129 = vector.broadcast %7 : vector<1x32xf32> to vector<32x32xf32>
    %130 = arith.addf %128, %129 : vector<32x32xf32>
    %131 = arith.addf %91, %130 : vector<32x32xf32>
    %c0_37 = arith.constant 0 : index
    %c0_38 = arith.constant 0 : index
    %132 = vector.load %arg10[%c0_37, %c0_38] : memref<32x32xf32, #tpu.memory_space<vmem>>, vector<32x32xf32>
    tpu.vector_store %arg10[%c0_37, %c0_38], %131 {strides = array<i32>} : memref<32x32xf32, #tpu.memory_space<vmem>>, vector<32x32xf32>,
    return
  }
  func.func @transform_0(%arg0: i32) -> (i32, i32) {
    %c0_i32 = arith.constant 0 : i32
    %c0_i32_0 = arith.constant 0 : i32
    %c0_i32_1 = arith.constant 0 : i32
    return %c0_i32, %c0_i32_0 : i32, i32
  }
  func.func @transform_1(%arg0: i32) -> (i32, i32) {
    %c0_i32 = arith.constant 0 : i32
    %c0_i32_0 = arith.constant 0 : i32
    %c0_i32_1 = arith.constant 0 : i32
    return %c0_i32, %c0_i32_0 : i32, i32
  }
  func.func @transform_2(%arg0: i32) -> (i32, i32) {
    %c0_i32 = arith.constant 0 : i32
    %c0_i32_0 = arith.constant 0 : i32
    %c0_i32_1 = arith.constant 0 : i32
    return %c0_i32, %c0_i32_0 : i32, i32
  }
  func.func @transform_3(%arg0: i32) -> (i32, i32) {
    %c0_i32 = arith.constant 0 : i32
    %c0_i32_0 = arith.constant 0 : i32
    %c0_i32_1 = arith.constant 0 : i32
    return %c0_i32, %c0_i32_0 : i32, i32
  }
  func.func @transform_4(%arg0: i32) -> (i32, i32) {
    %c0_i32 = arith.constant 0 : i32
    %c0_i32_0 = arith.constant 0 : i32
    %c0_i32_1 = arith.constant 0 : i32
    return %c0_i32, %c0_i32_0 : i32, i32
  }
  func.func @transform_5(%arg0: i32) -> (i32, i32) {
    %c0_i32 = arith.constant 0 : i32
    %c0_i32_0 = arith.constant 0 : i32
    %c0_i32_1 = arith.constant 0 : i32
    return %c0_i32, %c0_i32_0 : i32, i32
  }
  func.func @transform_6(%arg0: i32) -> (i32, i32) {
    %c0_i32 = arith.constant 0 : i32
    %c0_i32_0 = arith.constant 0 : i32
    %c0_i32_1 = arith.constant 0 : i32
    return %c0_i32, %c0_i32_0 : i32, i32
  }
  func.func @transform_7(%arg0: i32) -> (i32, i32) {
    %c0_i32 = arith.constant 0 : i32
    %c0_i32_0 = arith.constant 0 : i32
    %c0_i32_1 = arith.constant 0 : i32
    return %c0_i32, %c0_i32_0 : i32, i32
  }
  func.func @transform_8(%arg0: i32) -> (i32, i32) {
    %c0_i32 = arith.constant 0 : i32
    %c0_i32_0 = arith.constant 0 : i32
    %c0_i32_1 = arith.constant 0 : i32
    return %c0_i32, %c0_i32_0 : i32, i32
  }
  func.func @transform_9(%arg0: i32) -> (i32, i32) {
    %c0_i32 = arith.constant 0 : i32
    %c0_i32_0 = arith.constant 0 : i32
    %c0_i32_1 = arith.constant 0 : i32
    return %c0_i32, %c0_i32_0 : i32, i32
  }
}

</mosaic_0001>

<bundles_post_ra>
// kernel: tpu_custom_call.1
= control target key start
LH: loop header
LB: loop body
LE: loop exit
PB: predicated region body
PF: predicated region fallthrough
CT: control target
= control target key end

     0   :  { %14 = vsyncpa [#allocation3], 0  ;;  %s3166_s0 = inlined_call_operand.vmem [shape: f32[32,32], index: 0, kind: input, shape index: {}]   ;;  %s3167_s1 = inlined_call_operand.vmem [shape: f32[32,32], index: 1, kind: input, shape index: {}]   ;;  %s3168_s2 = inlined_call_operand.hbm [shape: f32[6,32], index: 2, kind: input, shape index: {}]   ;;  %s3169_s3 = inlined_call_operand.vmem [shape: f32[32,96], index: 3, kind: input, shape index: {}]   ;;  %s3170_s4 = inlined_call_operand.vmem [shape: f32[1,96], index: 4, kind: input, shape index: {}]   ;;  %s3171_s5 = inlined_call_operand.vmem [shape: f32[32,32], index: 5, kind: input, shape index: {}]   ;;  %s3172_s6 = inlined_call_operand.vmem [shape: f32[32,128], index: 6, kind: input, shape index: {}]   ;;  %s3173_s7 = inlined_call_operand.vmem [shape: f32[1,128], index: 7, kind: input, shape index: {}]   ;;  %s3174_s8 = inlined_call_operand.vmem [shape: f32[128,32], index: 8, kind: input, shape index: {}]   ;;  %s3175_s9 = inlined_call_operand.hbm [shape: f32[32,32], index: 9, kind: output, shape index: {}]  }
   0x1   :  { %15 = vsyncpa [#allocation4], 0  ;;  %s2536_s30 = smov [#allocation2]   ;;  %s2488_s13 = scalar_lea.hbm %s3168_s2, 128 }
   0x2   :  { %s26_s10 = sshll.u32 %s2536_s30, 4  ;;  %p2489_p0 = scmp.ne.s32.totalorder %s3168_s2, %s2488_s13  ;;  %s27_s10 = int_to_ptr.vmem [resolvable:$true] %s26_s10 }
   0x3   :  { %p2492_p1 = scmp.lt.u32.totalorder %s2488_s13, %s3168_s2 }
   0x5   :  { %p2494_p2 = pnand %p2492_p1, %p2489_p0 }
   0x7   :  { %2497 = shalt.err (!%p2494_p2)
}
   0x8   :  { %s2498_s18 = scalar_lea.vmem %s27_s10, 128  ;;  %p2503_p4 = scmp.lt.s32.totalorder %s27_s10, %s27_s10 }
   0x9   :  { %p2499_p3 = scmp.ne.s32.totalorder %s27_s10, %s2498_s18  ;;  %p2504_p5 = scmp.lt.s32.totalorder %s2498_s18, %s2498_s18 }
   0xb   :  { %p2505_p6 = por %p2504_p5, %p2503_p4 }
   0xd   :  { %p2506_p7 = pnand %p2505_p6, %p2499_p3 }
   0xf   :  { %2509 = shalt.err (!%p2506_p7)
}
  0x10   :  { %29 = dma.hbm_to_vmem [thread:$0]  %s3168_s2, 128, %s27_s10, [#allocation3]  }
  0x11   :  { %2532 = dma.done.wait [#allocation3], 128  }
  0x12   :  { %2533 = vsyncadd [#allocation3], 4294967168  ;;  %vm50_vm0 = vcmask 261120   ;;  %v45_v0 = vld [vmem:[%s3166_s0] sm:$0xff]  ;;  %v47_v1 = vld [vmem:[%s3166_s0 + $0x10] sm:$0xff]  ;;  %v104_v36 = vlaneseq  ;;  %vm268_vm1 = vcmask 64512  }
  0x13   :  { %v46_v2 = vld [vmem:[%s3166_s0 + $0x8] sm:$0xff]  ;;  %v51_v3 = vsel %vm50_vm0, %v45_v0, 0.0  ;;  %v57_v4 = vsel %vm50_vm0, %v47_v1, 0.0  ;;  %v48_v5 = vld [vmem:[%s3166_s0 + $0x18] sm:$0xff]  ;;  %v120_v28 = vld [vmem:[%s3169_s3] sm:$0xff]  ;;  %s2537_s16 = smov 120  }
  0x14   :  { %52 = vadd.xlane.f32.xlu0 %v51_v3  ;;  %58 = vadd.xlane.f32.xlu1 %v57_v4  ;;  %v54_v6 = vsel %vm50_vm0, %v46_v2, 0.0  ;;  %v60_v7 = vsel %vm50_vm0, %v48_v5, 0.0  ;;  %v121_v29 = vld [vmem:[%s3169_s3 + $0x8] sm:$0xff]  ;;  %v122_v30 = vld [vmem:[%s3169_s3 + $0x10] sm:$0xff]  ;;  %v123_v32 = vld [vmem:[%s3169_s3 + $0x18] sm:$0xff]  ;;  %v2641_v42 = vshrl.u32 %v104_v36, 7 }
  0x15   :  { %v2168_v31 = vpack.c.bf16 %v121_v29, %v120_v28  ;;  %v2172_v33 = vpack.c.bf16 %v123_v32, %v122_v30  ;;  %v49_v49 = vld [vmem:[#allocation2] sm:$0x3f]  ;;  %s2538_s17 = smov 112   ;;  %s2540_s18 = smov 96   ;;  %vm2710_vm2 = vmpackc.low %vm268_vm1, %vm268_vm1  ;;  %vm1361_vm3 = vcmask 130048   ;;  %vm1366_vm4 = vcmask 195584  }
  0x16   :  { %v106_v47 = vsub.s32 0, %v2641_v42  ;;  %v114_v50 = vsub.s32 1, %v2641_v42  ;;  %s2541_s19 = smov 64   ;;  %s2543_s14 = smov 16  }
  0x17   :  { %2169 = vmatprep.subr.bf16.mxu0 %v2168_v31 }
  0x18   :  { %55 = vadd.xlane.f32.xlu0 %v54_v6  ;;  %61 = vadd.xlane.f32.xlu1 %v60_v7  ;;  %v107_v51 = vrot.slane %v49_v49, %v106_v47  ;;  %v115_v54 = vrot.slane %v49_v49, %v114_v50 }
  0x19   :  { %2171 = vmatpush3.bf16.msra.mxu0 %v2168_v31 }
  0x1a   :  { %2173 = vmatprep.subr.bf16.mxu0 %v2172_v33 }
  0x1d   :  { %2175 = vmatpush3.bf16.msra.mxu0 %v2172_v33 }
  0xa1   :  { %v53_v8 = vpop.xlane.xlu0 %52  ;;  %v59_v9 = vpop.xlane.xlu1 %58 }
  0xa2   :  { %v64_v10 = vmul.f32 0.03125, %v53_v8  ;;  %v66_v11 = vmul.f32 0.03125, %v59_v9 }
  0xa4   :  { %v68_v12 = vsub.f32 %v45_v0, %v64_v10  ;;  %v70_v13 = vsub.f32 %v47_v1, %v66_v11 }
  0xa5   :  { %v56_v14 = vpop.xlane.xlu0 %55  ;;  %v62_v15 = vpop.xlane.xlu1 %61 }
  0xa6   :  { %v65_v16 = vmul.f32 0.03125, %v56_v14  ;;  %v67_v17 = vmul.f32 0.03125, %v62_v15  ;;  %v72_v18 = vmul.f32 %v68_v12, %v68_v12  ;;  %v74_v19 = vmul.f32 %v70_v13, %v70_v13 }
  0xa8   :  { %v69_v20 = vsub.f32 %v46_v2, %v65_v16  ;;  %v71_v21 = vsub.f32 %v48_v5, %v67_v17  ;;  %v76_v22 = vsel %vm50_vm0, %v72_v18, 0.0  ;;  %v82_v23 = vsel %vm50_vm0, %v74_v19, 0.0  ;;  %v1806_v5 = vld [vmem:[%s3170_s4] ss:$0 sm:$0xff]  ;;  %s2539_s4 = smov 104  }
  0xa9   :  { %77 = vadd.xlane.f32.xlu0 %v76_v22 }
  0xaa   :  { %v73_v24 = vmul.f32 %v69_v20, %v69_v20  ;;  %v75_v25 = vmul.f32 %v71_v21, %v71_v21 }
  0xac   :  { %v79_v26 = vsel %vm50_vm0, %v73_v24, 0.0  ;;  %v85_v27 = vsel %vm50_vm0, %v75_v25, 0.0 }
  0xad   :  { %83 = vadd.xlane.f32.xlu0 %v82_v23  ;;  %80 = vadd.xlane.f32.xlu1 %v79_v26 }
  0xb1   :  { %86 = vadd.xlane.f32.xlu1 %v85_v27 }
 0x136   :  { %v78_v34 = vpop.xlane.xlu0 %77 }
 0x137   :  { %v88_v35 = vmul.f32 0.03125, %v78_v34 }
 0x139   :  { %v92_v37 = vadd.f32 1e-05, %v88_v35 }
 0x13a   :  { %v81_v38 = vpop.xlane.xlu1 %80  ;;  %v84_v39 = vpop.xlane.xlu0 %83 }
 0x13b   :  { %2395 = vrsqrt.f32 %v92_v37  ;;  %v89_v40 = vmul.f32 0.03125, %v81_v38  ;;  %v90_v41 = vmul.f32 0.03125, %v84_v39 }
 0x13d   :  { %v93_v43 = vadd.f32 1e-05, %v89_v40  ;;  %v94_v44 = vadd.f32 1e-05, %v90_v41 }
 0x13e   :  { %v87_v45 = vpop.xlane.xlu1 %86 }
 0x13f   :  { %2397 = vrsqrt.f32 %v93_v43  ;;  %v91_v46 = vmul.f32 0.03125, %v87_v45 }
 0x140   :  { %2399 = vrsqrt.f32 %v94_v44 }
 0x141   :  { %v95_v48 = vadd.f32 1e-05, %v91_v46 }
 0x143   :  { %2401 = vrsqrt.f32 %v95_v48 }
 0x145   :  { %v2396_v52 = vpop.eup %2395 }
 0x146   :  { %v100_v53 = vmul.f32 %v2396_v52, %v68_v12 }
 0x148   :  { %v108_v55 = vmul.f32 %v107_v51, %v100_v53 }
 0x149   :  { %v2398_v56 = vpop.eup %2397 }
 0x14a   :  { %v2400_v57 = vpop.eup %2399  ;;  %v116_v58 = vadd.f32 %v115_v54, %v108_v55  ;;  %v101_v59 = vmul.f32 %v2398_v56, %v69_v20 }
 0x14b   :  { %v102_v60 = vmul.f32 %v2400_v57, %v70_v13 }
 0x14c   :  { %1984 = vmatprep.mubr.msk.f32.mxu0 %vm50_vm0, %v116_v58  ;;  %v109_v61 = vmul.f32 %v107_v51, %v101_v59 }
 0x14d   :  { %v2402_v62 = vpop.eup %2401  ;;  %v110_v63 = vmul.f32 %v107_v51, %v102_v60 }
 0x14e   :  { %v117_v0 = vadd.f32 %v115_v54, %v109_v61  ;;  %v103_v1 = vmul.f32 %v2402_v62, %v71_v21 }
 0x14f   :  { %v118_v2 = vadd.f32 %v115_v54, %v110_v63 }
 0x150   :  { %1985 = vmatmul.mubr.msk.f32.vlgmr.msra.gmra.mrb[0].mxu0 %vm50_vm0, %v117_v0  ;;  %v111_v3 = vmul.f32 %v107_v51, %v103_v1 }
 0x151   :  { %1987 = vmatprep.mubr.msk.f32.mxu0 %vm50_vm0, %v118_v2 }
 0x152   :  { %v119_v4 = vadd.f32 %v115_v54, %v111_v3 }
 0x154   :  { %1988 = vmatmul.mubr.msk.f32.gmra.mrb[2].mxu0 %vm50_vm0, %v119_v4 }
 0x223   :  { %v1986_v6 = vpop.f32.mrb[0].mxu0 }
 0x224   :  { %v2652_v7 = vadd.f32 %v1986_v6, %v1806_v5  ;;  %v209_v8 = vpop.f32.mrb[1].mxu0 }
 0x225   :  { %v210_v9 = vadd.f32 %v1806_v5, %v209_v8 }
 0x226   :  { %234 = vrot.lane.b32.xlu1 %v2652_v7, %s2537_s16 }
 0x227   :  { %232 = vrot.lane.b32.xlu0 %v210_v9, %s2537_s16  ;;  %v1989_v10 = vpop.f32.mrb[2].mxu0  ;;  %1998 = vmatprep.mubr.msk.f32.mxu0 %vm268_vm1, %v210_v9  ;;  %v2315_v14 = vpack.i.bf16 %v2652_v7, %v210_v9 }
 0x228   :  { %v2656_v11 = vadd.f32 %v1989_v10, %v1806_v5  ;;  %v219_v12 = vpop.f32.mrb[3].mxu0 }
 0x229   :  { %v220_v13 = vadd.f32 %v1806_v5, %v219_v12 }
 0x22a   :  { %238 = vrot.lane.b32.xlu1 %v2656_v11, %s2537_s16 }
 0x22b   :  { %240 = vrot.lane.b32.xlu0 %v210_v9, %s2538_s17  ;;  %v2320_v15 = vpack.i.bf16 %v2656_v11, %v220_v13 }
 0x22e   :  { %236 = vrot.lane.b32.xlu1 %v220_v13, %s2537_s16 }
 0x22f   :  { %248 = vrot.lane.b32.xlu0 %v210_v9, %s2539_s4 }
 0x232   :  { %242 = vrot.lane.b32.xlu1 %v2652_v7, %s2538_s17 }
 0x233   :  { %244 = vrot.lane.b32.xlu0 %v220_v13, %s2538_s17 }
 0x236   :  { %250 = vrot.lane.b32.xlu1 %v2652_v7, %s2539_s4 }
 0x237   :  { %252 = vrot.lane.b32.xlu0 %v220_v13, %s2539_s4 }
 0x23a   :  { %246 = vrot.lane.b32.xlu1 %v2656_v11, %s2538_s17 }
 0x23b   :  { %2316 = vrot.lane.b32.xlu0 %v2315_v14, %s2540_s18 }
 0x23e   :  { %254 = vrot.lane.b32.xlu1 %v2656_v11, %s2539_s4 }
 0x242   :  { %2321 = vrot.lane.b32.xlu1 %v2320_v15, %s2540_s18 }
 0x298   :  { %v2667_v16 = vpop.permute.xlu1 %234 }
 0x299   :  { %v233_v17 = vpop.permute.xlu0 %232 }
 0x29a   :  { %v2325_v18 = vpack.i.bf16 %v2667_v16, %v233_v17 }
 0x29c   :  { %v2670_v19 = vpop.permute.xlu1 %238  ;;  %2326 = vrot.lane.b32.xlu0 %v2325_v18, %s2540_s18 }
 0x29d   :  { %v241_v20 = vpop.permute.xlu0 %240 }
 0x29e   :  { %2026 = vmatprep.mubr.msk.f32.mxu1 %vm268_vm1, %v241_v20 }
 0x2a0   :  { %v2674_v21 = vpop.permute.xlu1 %236 }
 0x2a1   :  { %v2330_v22 = vpack.i.bf16 %v2670_v19, %v2674_v21  ;;  %v2678_v23 = vpop.permute.xlu0 %248 }
 0x2a3   :  { %2331 = vrot.lane.b32.xlu1 %v2330_v22, %s2540_s18 }
 0x2a4   :  { %v2681_v24 = vpop.permute.xlu1 %242 }
 0x2a5   :  { %v2684_v25 = vpack.i.bf16 %v2681_v24, %v241_v20  ;;  %v2686_v26 = vpop.permute.xlu0 %244  ;;  %v257_v20 = vld [vmem:[%s3167_s1 + $0x8] sm:$0xff] }
 0x2a7   :  { %2336 = vrot.lane.b32.xlu0 %v2684_v25, %s2540_s18 }
 0x2a8   :  { %v2690_v27 = vpop.permute.xlu1 %250 }
 0x2a9   :  { %v2694_v28 = vpack.i.bf16 %v2690_v27, %v2678_v23  ;;  %v2696_v29 = vpop.permute.xlu0 %252 }
 0x2ab   :  { %2341 = vrot.lane.b32.xlu1 %v2694_v28, %s2540_s18 }
 0x2ac   :  { %v2700_v30 = vpop.permute.xlu1 %246 }
 0x2ad   :  { %v2704_v31 = vpack.i.bf16 %v2700_v30, %v2686_v26  ;;  %v2317_v32 = vpop.permute.xlu0 %2316 }
 0x2ae   :  { %v2319_v33 = vunpack.i.h.bf16 %v2317_v32  ;;  %v2318_v34 = vunpack.i.l.bf16 %v2317_v32 }
 0x2af   :  { %2346 = vrot.lane.b32.xlu0 %v2704_v31, %s2540_s18 }
 0x2b0   :  { %v2176_v36 = vpack.c.bf16 %v2319_v33, %v2318_v34  ;;  %v2714_v37 = vpop.permute.xlu1 %254 }
 0x2b1   :  { %v2718_v38 = vpack.i.bf16 %v2714_v37, %v2696_v29 }
 0x2b2   :  { %2178 = vmatprep.subr.msk.bf16.mxu0 %vm2710_vm2, %v2176_v36 }
 0x2b3   :  { %2356 = vrot.lane.b32.xlu0 %v2315_v14, %s2541_s19  ;;  %2351 = vrot.lane.b32.xlu1 %v2718_v38, %s2540_s18 }
 0x2b4   :  { %2181 = vmatpush3.bf16.xpose.msk.msra.mxu0 %vm2710_vm2, %v2176_v36  ;;  %v2322_v39 = vpop.permute.xlu1 %2321 }
 0x2b5   :  { %v2324_v40 = vunpack.i.h.bf16 %v2322_v39  ;;  %v2323_v41 = vunpack.i.l.bf16 %v2322_v39 }
 0x2b7   :  { %v2182_v43 = vpack.c.bf16 %v2324_v40, %v2323_v41  ;;  %2361 = vrot.lane.b32.xlu1 %v2325_v18, %s2541_s19 }
 0x2b9   :  { %2184 = vmatprep.subr.msk.bf16.mxu0 %vm2710_vm2, %v2182_v43 }
 0x2bb   :  { %2366 = vrot.lane.b32.xlu1 %v2320_v15, %s2541_s19 }
 0x2bc   :  { %2187 = vmatpush3.bf16.xpose.msk.msra.mxu0 %vm2710_vm2, %v2182_v43 }
 0x2bf   :  { %2371 = vrot.lane.b32.xlu1 %v2330_v22, %s2541_s19 }
 0x2c3   :  { %1999 = vmatmul.mubr.msk.f32.vlgmr.msra.gmra.mrb[4].mxu0 %vm268_vm1, %v2652_v7 }
 0x2c4   :  { %2001 = vmatprep.mubr.msk.f32.mxu0 %vm268_vm1, %v220_v13 }
 0x2c7   :  { %2002 = vmatmul.mubr.msk.f32.gmra.mrb[6].mxu0 %vm268_vm1, %v2656_v11 }
 0x2c8   :  { %2012 = vmatprep.mubr.msk.f32.mxu0 %vm268_vm1, %v233_v17 }
 0x30e   :  { %v2327_v44 = vpop.permute.xlu0 %2326 }
 0x30f   :  { %v2329_v45 = vunpack.i.h.bf16 %v2327_v44  ;;  %v2328_v46 = vunpack.i.l.bf16 %v2327_v44 }
 0x311   :  { %v2188_v47 = vpack.c.bf16 %v2329_v45, %v2328_v46 }
 0x313   :  { %2190 = vmatprep.subr.msk.bf16.mxu0 %vm2710_vm2, %v2188_v47 }
 0x314   :  { %2193 = vmatpush3.bf16.xpose.msk.msra.mxu0 %vm2710_vm2, %v2188_v47 }
 0x315   :  { %v2332_v48 = vpop.permute.xlu1 %2331 }
 0x316   :  { %v2334_v49 = vunpack.i.h.bf16 %v2332_v48  ;;  %v2333_v50 = vunpack.i.l.bf16 %v2332_v48 }
 0x318   :  { %v2194_v51 = vpack.c.bf16 %v2334_v49, %v2333_v50 }
 0x319   :  { %v2337_v52 = vpop.permute.xlu0 %2336 }
 0x31a   :  { %v2339_v53 = vunpack.i.h.bf16 %v2337_v52  ;;  %v2338_v54 = vunpack.i.l.bf16 %v2337_v52  ;;  %2196 = vmatprep.subr.msk.bf16.mxu0 %vm2710_vm2, %v2194_v51 }
 0x31c   :  { %2199 = vmatpush3.bf16.xpose.msk.msra.mxu0 %vm2710_vm2, %v2194_v51  ;;  %v2200_v55 = vpack.c.bf16 %v2339_v53, %v2338_v54 }
 0x31d   :  { %v2342_v56 = vpop.permute.xlu1 %2341 }
 0x31e   :  { %v2344_v57 = vunpack.i.h.bf16 %v2342_v56  ;;  %v2343_v58 = vunpack.i.l.bf16 %v2342_v56  ;;  %2202 = vmatprep.subr.msk.bf16.mxu1 %vm2710_vm2, %v2200_v55 }
 0x31f   :  { %2205 = vmatpush3.bf16.xpose.msk.msra.mxu1 %vm2710_vm2, %v2200_v55 }
 0x320   :  { %v2212_v59 = vpack.c.bf16 %v2344_v57, %v2343_v58 }
 0x321   :  { %v2347_v60 = vpop.permute.xlu0 %2346 }
 0x322   :  { %v2349_v61 = vunpack.i.h.bf16 %v2347_v60  ;;  %v2348_v62 = vunpack.i.l.bf16 %v2347_v60  ;;  %2214 = vmatprep.subr.msk.bf16.mxu0 %vm2710_vm2, %v2212_v59 }
 0x323   :  { %2013 = vmatmul.mubr.msk.f32.vlgmr.msra.gmra.mrb[8].mxu0 %vm268_vm1, %v2667_v16 }
 0x324   :  { %v2206_v63 = vpack.c.bf16 %v2349_v61, %v2348_v62  ;;  %2015 = vmatprep.mubr.msk.f32.mxu0 %vm268_vm1, %v2674_v21  ;;  %2217 = vmatpush3.bf16.xpose.msk.msra.mxu0 %vm2710_vm2, %v2212_v59  ;;  %v256_v21 = vld [vmem:[%s3167_s1] sm:$0xff] }
 0x325   :  { %v2352_v0 = vpop.permute.xlu1 %2351  ;;  %v2357_v1 = vpop.permute.xlu0 %2356 }
 0x326   :  { %v2354_v2 = vunpack.i.h.bf16 %v2352_v0  ;;  %v2353_v3 = vunpack.i.l.bf16 %v2352_v0  ;;  %v2359_v4 = vunpack.i.h.bf16 %v2357_v1  ;;  %v2358_v5 = vunpack.i.l.bf16 %v2357_v1  ;;  %2208 = vmatprep.subr.msk.bf16.mxu1 %vm2710_vm2, %v2206_v63 }
 0x327   :  { %2016 = vmatmul.mubr.msk.f32.gmra.mrb[10].mxu0 %vm268_vm1, %v2670_v19  ;;  %2211 = vmatpush3.bf16.xpose.msk.msra.mxu1 %vm2710_vm2, %v2206_v63 }
 0x328   :  { %v2218_v6 = vpack.c.bf16 %v2354_v2, %v2353_v3  ;;  %v2224_v7 = vpack.c.bf16 %v2359_v4, %v2358_v5  ;;  %2040 = vmatprep.mubr.msk.f32.mxu0 %vm268_vm1, %v2678_v23 }
 0x329   :  { %v2362_v8 = vpop.permute.xlu1 %2361 }
 0x32a   :  { %v2364_v9 = vunpack.i.h.bf16 %v2362_v8  ;;  %v2363_v10 = vunpack.i.l.bf16 %v2362_v8  ;;  %2220 = vmatprep.subr.msk.bf16.mxu0 %vm2710_vm2, %v2218_v6  ;;  %2225 = vmatprep.subr.bf16.mxu1 %v2224_v7 }
 0x32c   :  { %v2232_v11 = vpack.c.bf16 %v2364_v9, %v2363_v10  ;;  %2223 = vmatpush3.bf16.xpose.msk.msra.mxu0 %vm2710_vm2, %v2218_v6 }
 0x32d   :  { %v2367_v12 = vpop.permute.xlu1 %2366 }
 0x32e   :  { %v2369_v13 = vunpack.i.h.bf16 %v2367_v12  ;;  %v2368_v14 = vunpack.i.l.bf16 %v2367_v12  ;;  %2027 = vmatmul.mubr.msk.f32.vlgmr.msra.gmra.mrb[0].mxu1 %vm268_vm1, %v2681_v24  ;;  %2233 = vmatprep.subr.bf16.mxu0 %v2232_v11 }
 0x32f   :  { %2029 = vmatprep.mubr.msk.f32.mxu1 %vm268_vm1, %v2686_v26  ;;  %2227 = vmatpush3.bf16.msra.mxu1 %v2224_v7 }
 0x330   :  { %v2228_v15 = vpack.c.bf16 %v2369_v13, %v2368_v14 }
 0x331   :  { %v2372_v16 = vpop.permute.xlu1 %2371 }
 0x332   :  { %v2374_v17 = vunpack.i.h.bf16 %v2372_v16  ;;  %v2373_v18 = vunpack.i.l.bf16 %v2372_v16  ;;  %2030 = vmatmul.mubr.msk.f32.gmra.mrb[2].mxu1 %vm268_vm1, %v2700_v30  ;;  %2229 = vmatprep.subr.bf16.mxu1 %v2228_v15  ;;  %v258_v30 = vld [vmem:[%s3167_s1 + $0x10] sm:$0xff] }
 0x333   :  { %2041 = vmatmul.mubr.msk.f32.vlgmr.msra.gmra.mrb[12].mxu0 %vm268_vm1, %v2690_v27  ;;  %2231 = vmatpush3.bf16.msra.mxu1 %v2228_v15  ;;  %v259_v27 = vld [vmem:[%s3167_s1 + $0x18] sm:$0xff]  ;;  %s2542_s1 = smov 8  }
 0x334   :  { %v2236_v19 = vpack.c.bf16 %v2374_v17, %v2373_v18  ;;  %2043 = vmatprep.mubr.msk.f32.mxu0 %vm268_vm1, %v2696_v29  ;;  %2235 = vmatpush3.bf16.msra.mxu0 %v2232_v11 }
 0x336   :  { %2237 = vmatprep.subr.bf16.mxu0 %v2236_v19 }
 0x337   :  { %2044 = vmatmul.mubr.msk.f32.gmra.mrb[14].mxu0 %vm268_vm1, %v2714_v37 }
 0x338   :  { %2239 = vmatpush3.bf16.msra.mxu0 %v2236_v19 }
 0x396   :  { %v2000_v22 = vpop.f32.mrb[4].mxu0 }
 0x397   :  { %v2790_v23 = vadd.f32 %v2000_v22, %v257_v20  ;;  %v351_v24 = vpop.f32.mrb[5].mxu0 }
 0x398   :  { %v2792_v26 = vadd.f32 %v351_v24, %v256_v21 }
 0x399   :  { %v700_v29 = vsel %vm50_vm0, %v2790_v23, -inf }
 0x39a   :  { %701 = vmax.xlane.f32.xlu1 %v700_v29  ;;  %v2003_v32 = vpop.f32.mrb[6].mxu0  ;;  %v697_v33 = vsel %vm50_vm0, %v2792_v26, -inf }
 0x39b   :  { %v2804_v34 = vadd.f32 %v2003_v32, %v259_v27  ;;  %v361_v35 = vpop.f32.mrb[7].mxu0  ;;  %698 = vmax.xlane.f32.xlu0 %v697_v33 }
 0x39c   :  { %v2806_v36 = vadd.f32 %v361_v35, %v258_v30 }
 0x39d   :  { %v706_v37 = vsel %vm50_vm0, %v2804_v34, -inf }
 0x39e   :  { %707 = vmax.xlane.f32.xlu1 %v706_v37  ;;  %v703_v39 = vsel %vm50_vm0, %v2806_v36, -inf }
 0x39f   :  { %704 = vmax.xlane.f32.xlu0 %v703_v39 }
 0x3f6   :  { %v2014_v40 = vpop.f32.mrb[8].mxu0 }
 0x3f7   :  { %v2812_v41 = vadd.f32 %v2014_v40, %v257_v20  ;;  %v460_v43 = vpop.f32.mrb[9].mxu0 }
 0x3f8   :  { %v2814_v44 = vadd.f32 %v460_v43, %v256_v21 }
 0x3f9   :  { %v712_v45 = vsel %vm50_vm0, %v2812_v41, -inf }
 0x3fa   :  { %v2017_v46 = vpop.f32.mrb[10].mxu0  ;;  %713 = vmax.xlane.f32.xlu0 %v712_v45  ;;  %v709_v48 = vsel %vm50_vm0, %v2814_v44, -inf }
 0x3fb   :  { %v470_v47 = vpop.f32.mrb[11].mxu0  ;;  %v2824_v53 = vadd.f32 %v2017_v46, %v259_v27 }
 0x3fc   :  { %v2828_v55 = vadd.f32 %v470_v47, %v258_v30 }
 0x3fd   :  { %v718_v62 = vsel %vm50_vm0, %v2824_v53, -inf }
 0x3fe   :  { %710 = vmax.xlane.f32.xlu0 %v709_v48  ;;  %v715_v0 = vsel %vm50_vm0, %v2828_v55, -inf }
 0x401   :  { %v2028_v49 = vpop.f32.mrb[0].mxu1 }
 0x402   :  { %v2820_v50 = vadd.f32 %v2028_v49, %v257_v20  ;;  %v569_v51 = vpop.f32.mrb[1].mxu1 }
 0x403   :  { %v2822_v52 = vadd.f32 %v569_v51, %v256_v21 }
 0x404   :  { %v724_v54 = vsel %vm50_vm0, %v2820_v50, -inf }
 0x405   :  { %v2031_v56 = vpop.f32.mrb[2].mxu1  ;;  %725 = vmax.xlane.f32.xlu1 %v724_v54  ;;  %v721_v57 = vsel %vm50_vm0, %v2822_v52, -inf }
 0x406   :  { %v579_v58 = vpop.f32.mrb[3].mxu1  ;;  %v2042_v59 = vpop.f32.mrb[12].mxu0  ;;  %722 = vmax.xlane.f32.xlu0 %v721_v57  ;;  %v2832_v61 = vadd.f32 %v2031_v56, %v259_v27 }
 0x407   :  { %v678_v60 = vpop.f32.mrb[13].mxu0  ;;  %v2836_v63 = vadd.f32 %v579_v58, %v258_v30  ;;  %v2840_v3 = vadd.f32 %v2042_v59, %v257_v20 }
 0x408   :  { %v730_v4 = vsel %vm50_vm0, %v2832_v61, -inf  ;;  %v2844_v5 = vadd.f32 %v678_v60, %v256_v21 }
 0x409   :  { %719 = vmax.xlane.f32.xlu1 %v718_v62  ;;  %v727_v6 = vsel %vm50_vm0, %v2836_v63, -inf  ;;  %v736_v8 = vsel %vm50_vm0, %v2840_v3, -inf }
 0x40a   :  { %v2045_v1 = vpop.f32.mrb[14].mxu0  ;;  %716 = vmax.xlane.f32.xlu0 %v715_v0  ;;  %v733_v10 = vsel %vm50_vm0, %v2844_v5, -inf }
 0x40b   :  { %v688_v2 = vpop.f32.mrb[15].mxu0  ;;  %v2848_v7 = vadd.f32 %v2045_v1, %v259_v27 }
 0x40c   :  { %v2852_v9 = vadd.f32 %v688_v2, %v258_v30 }
 0x40d   :  { %731 = vmax.xlane.f32.xlu1 %v730_v4  ;;  %v742_v11 = vsel %vm50_vm0, %v2848_v7, -inf }
 0x40e   :  { %728 = vmax.xlane.f32.xlu0 %v727_v6  ;;  %v739_v12 = vsel %vm50_vm0, %v2852_v9, -inf }
 0x411   :  { %737 = vmax.xlane.f32.xlu1 %v736_v8 }
 0x412   :  { %734 = vmax.xlane.f32.xlu0 %v733_v10 }
 0x415   :  { %743 = vmax.xlane.f32.xlu1 %v742_v11 }
 0x416   :  { %740 = vmax.xlane.f32.xlu0 %v739_v12 }
 0x426   :  { %2381 = vrot.lane.b32.xlu1 %v2694_v28, %s2541_s19 }
 0x427   :  { %v702_v13 = vpop.xlane.xlu1 %701 }
 0x428   :  { %v699_v14 = vpop.xlane.xlu0 %698  ;;  %v746_v15 = vsub.f32 %v2790_v23, %v702_v13 }
 0x429   :  { %v745_v16 = vsub.f32 %v2792_v26, %v699_v14 }
 0x42a   :  { %v763_v19 = vmul.f32 1.442695, %v746_v15 }
 0x42b   :  { %v708_v17 = vpop.xlane.xlu1 %707  ;;  %v761_v21 = vmul.f32 1.442695, %v745_v16 }
 0x42c   :  { %2376 = vrot.lane.b32.xlu0 %v2684_v25, %s2541_s19  ;;  %v705_v18 = vpop.xlane.xlu0 %704  ;;  %v748_v20 = vsub.f32 %v2804_v34, %v708_v17  ;;  %2403 = vpow2.f32 %v763_v19 }
 0x42d   :  { %v747_v22 = vsub.f32 %v2806_v36, %v705_v18  ;;  %2405 = vpow2.f32 %v761_v21 }
 0x42e   :  { %v767_v24 = vmul.f32 1.442695, %v748_v20 }
 0x42f   :  { %v765_v28 = vmul.f32 1.442695, %v747_v22 }
 0x430   :  { %2407 = vpow2.f32 %v767_v24 }
 0x431   :  { %2409 = vpow2.f32 %v765_v28 }
 0x436   :  { %v2868_v25 = vpop.eup %2403 }
 0x437   :  { %v2870_v27 = vpop.eup %2405  ;;  %v796_v23 = vsel %vm50_vm0, %v2868_v25, 0.0 }
 0x438   :  { %v793_v29 = vsel %vm50_vm0, %v2870_v27, 0.0 }
 0x43a   :  { %v2874_v26 = vpop.eup %2407 }
 0x43b   :  { %v2878_v30 = vpop.eup %2409  ;;  %v802_v32 = vsel %vm50_vm0, %v2874_v26, 0.0 }
 0x43c   :  { %v799_v33 = vsel %vm50_vm0, %v2878_v30, 0.0 }
 0x44a   :  { %797 = vadd.xlane.f32.xlu1 %v796_v23 }
 0x44b   :  { %794 = vadd.xlane.f32.xlu0 %v793_v29 }
 0x44e   :  { %803 = vadd.xlane.f32.xlu1 %v802_v32 }
 0x44f   :  { %800 = vadd.xlane.f32.xlu0 %v799_v33 }
 0x487   :  { %v714_v34 = vpop.xlane.xlu0 %713 }
 0x488   :  { %v750_v35 = vsub.f32 %v2812_v41, %v714_v34 }
 0x48a   :  { %v771_v36 = vmul.f32 1.442695, %v750_v35 }
 0x48b   :  { %v711_v37 = vpop.xlane.xlu0 %710 }
 0x48c   :  { %2411 = vpow2.f32 %v771_v36  ;;  %v749_v39 = vsub.f32 %v2814_v44, %v711_v37 }
 0x48e   :  { %v769_v40 = vmul.f32 1.442695, %v749_v39 }
 0x490   :  { %2413 = vpow2.f32 %v769_v40 }
 0x492   :  { %v726_v43 = vpop.xlane.xlu1 %725 }
 0x493   :  { %v754_v45 = vsub.f32 %v2820_v50, %v726_v43  ;;  %v723_v46 = vpop.xlane.xlu0 %722 }
 0x494   :  { %v753_v47 = vsub.f32 %v2822_v52, %v723_v46 }
 0x495   :  { %v779_v48 = vmul.f32 1.442695, %v754_v45 }
 0x496   :  { %v2888_v49 = vpop.eup %2411  ;;  %v777_v51 = vmul.f32 1.442695, %v753_v47  ;;  %v720_v54 = vpop.xlane.xlu1 %719 }
 0x497   :  { %2415 = vpow2.f32 %v779_v48  ;;  %v752_v41 = vsub.f32 %v2824_v53, %v720_v54  ;;  %v717_v56 = vpop.xlane.xlu0 %716  ;;  %v808_v44 = vsel %vm50_vm0, %v2888_v49, 0.0 }
 0x498   :  { %2417 = vpow2.f32 %v777_v51  ;;  %v751_v57 = vsub.f32 %v2828_v55, %v717_v56  ;;  %809 = vadd.xlane.f32.xlu1 %v808_v44 }
 0x499   :  { %v775_v50 = vmul.f32 1.442695, %v752_v41 }
 0x49a   :  { %v2894_v58 = vpop.eup %2413  ;;  %v773_v52 = vmul.f32 1.442695, %v751_v57  ;;  %v732_v59 = vpop.xlane.xlu1 %731 }
 0x49b   :  { %2419 = vpow2.f32 %v775_v50  ;;  %v756_v60 = vsub.f32 %v2832_v61, %v732_v59  ;;  %v729_v62 = vpop.xlane.xlu0 %728  ;;  %v805_v53 = vsel %vm50_vm0, %v2894_v58, 0.0 }
 0x49c   :  { %2421 = vpow2.f32 %v773_v52  ;;  %v755_v0 = vsub.f32 %v2836_v63, %v729_v62  ;;  %806 = vadd.xlane.f32.xlu0 %v805_v53 }
 0x49d   :  { %v783_v1 = vmul.f32 1.442695, %v756_v60 }
 0x49e   :  { %v781_v2 = vmul.f32 1.442695, %v755_v0  ;;  %v738_v55 = vpop.xlane.xlu1 %737 }
 0x49f   :  { %2423 = vpow2.f32 %v783_v1  ;;  %v758_v4 = vsub.f32 %v2840_v3, %v738_v55  ;;  %v735_v6 = vpop.xlane.xlu0 %734 }
 0x4a0   :  { %2425 = vpow2.f32 %v781_v2  ;;  %v757_v8 = vsub.f32 %v2844_v5, %v735_v6 }
 0x4a1   :  { %v2902_v10 = vpop.eup %2415  ;;  %v787_v61 = vmul.f32 1.442695, %v758_v4 }
 0x4a2   :  { %v2904_v11 = vpop.eup %2417  ;;  %v785_v12 = vmul.f32 1.442695, %v757_v8  ;;  %v744_v13 = vpop.xlane.xlu1 %743  ;;  %v820_v63 = vsel %vm50_vm0, %v2902_v10, 0.0 }
 0x4a3   :  { %2427 = vpow2.f32 %v787_v61  ;;  %v760_v14 = vsub.f32 %v2848_v7, %v744_v13  ;;  %821 = vadd.xlane.f32.xlu1 %v820_v63  ;;  %v741_v15 = vpop.xlane.xlu0 %740  ;;  %v817_v3 = vsel %vm50_vm0, %v2904_v11, 0.0 }
 0x4a4   :  { %2429 = vpow2.f32 %v785_v12  ;;  %v759_v5 = vsub.f32 %v2852_v9, %v741_v15  ;;  %818 = vadd.xlane.f32.xlu0 %v817_v3 }
 0x4a5   :  { %v2912_v16 = vpop.eup %2419  ;;  %v791_v17 = vmul.f32 1.442695, %v760_v14 }
 0x4a6   :  { %v2914_v18 = vpop.eup %2421  ;;  %v789_v19 = vmul.f32 1.442695, %v759_v5  ;;  %v2382_v20 = vpop.permute.xlu1 %2381  ;;  %v814_v21 = vsel %vm50_vm0, %v2912_v16, 0.0 }
 0x4a7   :  { %2431 = vpow2.f32 %v791_v17  ;;  %v2384_v7 = vunpack.i.h.bf16 %v2382_v20  ;;  %v2383_v22 = vunpack.i.l.bf16 %v2382_v20  ;;  %815 = vadd.xlane.f32.xlu1 %v814_v21  ;;  %v2377_v24 = vpop.permute.xlu0 %2376  ;;  %v811_v28 = vsel %vm50_vm0, %v2914_v18, 0.0 }
 0x4a8   :  { %2433 = vpow2.f32 %v789_v19  ;;  %v2379_v9 = vunpack.i.h.bf16 %v2377_v24  ;;  %v2378_v23 = vunpack.i.l.bf16 %v2377_v24  ;;  %812 = vadd.xlane.f32.xlu0 %v811_v28 }
 0x4a9   :  { %v2920_v29 = vpop.eup %2423  ;;  %v2248_v32 = vpack.c.bf16 %v2384_v7, %v2383_v22 }
 0x4aa   :  { %v2922_v33 = vpop.eup %2425  ;;  %v2240_v34 = vpack.c.bf16 %v2379_v9, %v2378_v23  ;;  %v826_v35 = vsel %vm50_vm0, %v2920_v29, 0.0 }
 0x4ab   :  { %2249 = vmatprep.subr.bf16.mxu0 %v2248_v32  ;;  %827 = vadd.xlane.f32.xlu1 %v826_v35  ;;  %v823_v36 = vsel %vm50_vm0, %v2922_v33, 0.0 }
 0x4ac   :  { %824 = vadd.xlane.f32.xlu0 %v823_v36  ;;  %2241 = vmatprep.subr.bf16.mxu1 %v2240_v34 }
 0x4ad   :  { %v2928_v37 = vpop.eup %2427 }
 0x4ae   :  { %v2930_v39 = vpop.eup %2429  ;;  %v832_v40 = vsel %vm50_vm0, %v2928_v37, 0.0 }
 0x4af   :  { %833 = vadd.xlane.f32.xlu1 %v832_v40  ;;  %v829_v43 = vsel %vm50_vm0, %v2930_v39, 0.0 }
 0x4b0   :  { %830 = vadd.xlane.f32.xlu0 %v829_v43 }
 0x4b1   :  { %v2936_v45 = vpop.eup %2431 }
 0x4b2   :  { %v2938_v46 = vpop.eup %2433  ;;  %v838_v47 = vsel %vm50_vm0, %v2936_v45, 0.0 }
 0x4b3   :  { %839 = vadd.xlane.f32.xlu1 %v838_v47  ;;  %v835_v48 = vsel %vm50_vm0, %v2938_v46, 0.0 }
 0x4b4   :  { %836 = vadd.xlane.f32.xlu0 %v835_v48 }
 0x4c4   :  { %2391 = vrot.lane.b32.xlu1 %v2718_v38, %s2541_s19 }
 0x4ca   :  { %2386 = vrot.lane.b32.xlu0 %v2704_v31, %s2541_s19 }
 0x4d7   :  { %v798_v51 = vpop.xlane.xlu1 %797 }
 0x4d8   :  { %2435 = vrcp.f32 %v798_v51  ;;  %v795_v54 = vpop.xlane.xlu0 %794 }
 0x4d9   :  { %2437 = vrcp.f32 %v795_v54 }
 0x4db   :  { %v804_v41 = vpop.xlane.xlu1 %803 }
 0x4dc   :  { %2439 = vrcp.f32 %v804_v41  ;;  %v801_v56 = vpop.xlane.xlu0 %800 }
 0x4dd   :  { %2441 = vrcp.f32 %v801_v56 }
 0x4e2   :  { %v2436_v44 = vpop.eup %2435 }
 0x4e3   :  { %v2438_v57 = vpop.eup %2437  ;;  %v858_v52 = vmul.f32 %v2436_v44, %v2868_v25  ;;  %v1373_v44 = vld [vmem:[%s3171_s5 + $0x10] sm:$0xff] }
 0x4e4   :  { %v857_v50 = vmul.f32 %v2438_v57, %v2870_v27  ;;  %v1374_v57 = vld [vmem:[%s3171_s5 + $0x18] sm:$0xff] }
 0x4e6   :  { %v2440_v59 = vpop.eup %2439  ;;  %2054 = vmatprep.mubr.msk.f32.mxu1 %vm50_vm0, %v857_v50  ;;  %v2260_v50 = vpack.c.bf16 %v1374_v57, %v1373_v44 }
 0x4e7   :  { %v2442_v38 = vpop.eup %2441  ;;  %2055 = vmatmul.mubr.msk.f32.vlgmr.msra.gmra.mrb[4].mxu1 %vm50_vm0, %v858_v52  ;;  %v860_v60 = vmul.f32 %v2440_v59, %v2874_v26 }
 0x4e8   :  { %2243 = vmatpush3.bf16.msra.mxu1 %v2240_v34  ;;  %v859_v31 = vmul.f32 %v2442_v38, %v2878_v30 }
 0x4ea   :  { %2057 = vmatprep.mubr.msk.f32.mxu1 %vm50_vm0, %v859_v31 }
 0x4eb   :  { %2058 = vmatmul.mubr.msk.f32.gmra.mrb[6].mxu1 %vm50_vm0, %v860_v60 }
 0x525   :  { %v810_v62 = vpop.xlane.xlu1 %809 }
 0x526   :  { %2443 = vrcp.f32 %v810_v62 }
 0x529   :  { %v807_v27 = vpop.xlane.xlu0 %806 }
 0x52a   :  { %2445 = vrcp.f32 %v807_v27 }
 0x530   :  { %v822_v25 = vpop.xlane.xlu1 %821  ;;  %v2444_v0 = vpop.eup %2443 }
 0x531   :  { %v819_v53 = vpop.xlane.xlu0 %818  ;;  %v862_v26 = vmul.f32 %v2444_v0, %v2888_v49 }
 0x532   :  { %2447 = vrcp.f32 %v819_v53 }
 0x534   :  { %v2446_v1 = vpop.eup %2445  ;;  %v816_v2 = vpop.xlane.xlu1 %815 }
 0x535   :  { %2449 = vrcp.f32 %v816_v2  ;;  %v813_v55 = vpop.xlane.xlu0 %812  ;;  %v861_v30 = vmul.f32 %v2446_v1, %v2894_v58 }
 0x536   :  { %2451 = vrcp.f32 %v813_v55 }
 0x537   :  { %2068 = vmatprep.mubr.msk.f32.mxu0 %vm50_vm0, %v861_v30 }
 0x538   :  { %v828_v4 = vpop.xlane.xlu1 %827  ;;  %2069 = vmatmul.mubr.msk.f32.vlgmr.msra.gmra.mrb[16].mxu0 %vm50_vm0, %v862_v26 }
 0x539   :  { %2251 = vmatpush3.bf16.msra.mxu0 %v2248_v32  ;;  %v825_v6 = vpop.xlane.xlu0 %824 }
 0x53c   :  { %v2448_v8 = vpop.eup %2447  ;;  %v834_v61 = vpop.xlane.xlu1 %833 }
 0x53d   :  { %2453 = vrcp.f32 %v834_v61  ;;  %v831_v12 = vpop.xlane.xlu0 %830  ;;  %v865_v13 = vmul.f32 %v2448_v8, %v2904_v11 }
 0x53e   :  { %2455 = vrcp.f32 %v831_v12 }
 0x53f   :  { %v2450_v63 = vpop.eup %2449  ;;  %2457 = vrcp.f32 %v822_v25  ;;  %2082 = vmatprep.mubr.msk.f32.mxu1 %vm50_vm0, %v865_v13 }
 0x540   :  { %v2452_v49 = vpop.eup %2451  ;;  %2459 = vrcp.f32 %v825_v6  ;;  %v840_v58 = vpop.xlane.xlu1 %839  ;;  %v864_v3 = vmul.f32 %v2450_v63, %v2912_v16 }
 0x541   :  { %2461 = vrcp.f32 %v840_v58  ;;  %v837_v14 = vpop.xlane.xlu0 %836  ;;  %v863_v15 = vmul.f32 %v2452_v49, %v2914_v18 }
 0x542   :  { %2463 = vrcp.f32 %v837_v14 }
 0x543   :  { %2465 = vrcp.f32 %v828_v4  ;;  %2071 = vmatprep.mubr.msk.f32.mxu0 %vm50_vm0, %v863_v15 }
 0x544   :  { %v2392_v5 = vpop.permute.xlu1 %2391  ;;  %2072 = vmatmul.mubr.msk.f32.gmra.mrb[18].mxu0 %vm50_vm0, %v864_v3 }
 0x545   :  { %v2394_v11 = vunpack.i.h.bf16 %v2392_v5  ;;  %v2393_v17 = vunpack.i.l.bf16 %v2392_v5  ;;  %v2387_v19 = vpop.permute.xlu0 %2386 }
 0x546   :  { %v2389_v20 = vunpack.i.h.bf16 %v2387_v19  ;;  %v2388_v21 = vunpack.i.l.bf16 %v2387_v19 }
 0x547   :  { %v2454_v7 = vpop.eup %2453  ;;  %v2252_v22 = vpack.c.bf16 %v2394_v11, %v2393_v17 }
 0x548   :  { %v2456_v24 = vpop.eup %2455  ;;  %v2244_v28 = vpack.c.bf16 %v2389_v20, %v2388_v21  ;;  %v870_v32 = vmul.f32 %v2454_v7, %v2928_v37  ;;  %v1377_v21 = vsub.s32 4, %v2641_v42  ;;  %v3013_v7 = vld [vmem:[#allocation2] sm:$0x3f] }
 0x549   :  { %v2458_v9 = vpop.eup %2457  ;;  %2253 = vmatprep.subr.bf16.mxu0 %v2252_v22  ;;  %v869_v18 = vmul.f32 %v2456_v24, %v2930_v39 }
 0x54a   :  { %v2460_v16 = vpop.eup %2459  ;;  %2245 = vmatprep.subr.bf16.mxu1 %v2244_v28  ;;  %2255 = vmatpush3.bf16.msra.mxu0 %v2252_v22  ;;  %v866_v35 = vmul.f32 %v2458_v9, %v2902_v10  ;;  %v1378_v22 = vrot.slane %v3013_v7, %v1377_v21 }
 0x54b   :  { %v2462_v23 = vpop.eup %2461  ;;  %2247 = vmatpush3.bf16.msra.mxu1 %v2244_v28  ;;  %2096 = vmatprep.mubr.msk.f32.mxu0 %vm50_vm0, %v869_v18  ;;  %v867_v40 = vmul.f32 %v2460_v16, %v2922_v33  ;;  %v2484_v16 = vld [vmem:[%s3166_s0 + $0x8] sm:$0xff] }
 0x54c   :  { %v2464_v34 = vpop.eup %2463  ;;  %v872_v37 = vmul.f32 %v2462_v23, %v2936_v45  ;;  %v1372_v45 = vld [vmem:[%s3171_s5 + $0x8] sm:$0xff] }
 0x54d   :  { %v2466_v36 = vpop.eup %2465  ;;  %2097 = vmatmul.mubr.msk.f32.vlgmr.msra.gmra.mrb[20].mxu0 %vm50_vm0, %v870_v32  ;;  %v871_v43 = vmul.f32 %v2464_v34, %v2938_v46  ;;  %v2485_v32 = vld [vmem:[%s3166_s0] sm:$0xff] }
 0x54e   :  { %2083 = vmatmul.mubr.msk.f32.vlgmr.msra.gmra.mrb[8].mxu1 %vm50_vm0, %v866_v35  ;;  %v868_v39 = vmul.f32 %v2466_v36, %v2920_v29  ;;  %v1371_v29 = vld [vmem:[%s3171_s5] sm:$0xff]  ;;  %s2544_s5 = smov 24  }
 0x54f   :  { %2085 = vmatprep.mubr.msk.f32.mxu1 %vm50_vm0, %v867_v40  ;;  %2099 = vmatprep.mubr.msk.f32.mxu0 %vm50_vm0, %v871_v43  ;;  %v2256_v56 = vpack.c.bf16 %v1372_v45, %v1371_v29 }
 0x551   :  { %2100 = vmatmul.mubr.msk.f32.gmra.mrb[22].mxu0 %vm50_vm0, %v872_v37  ;;  %2257 = vmatprep.subr.bf16.mxu1 %v2256_v56 }
 0x552   :  { %2086 = vmatmul.mubr.msk.f32.gmra.mrb[10].mxu1 %vm50_vm0, %v868_v39 }
 0x553   :  { %2259 = vmatpush3.bf16.msra.mxu1 %v2256_v56 }
 0x554   :  { %2261 = vmatprep.subr.bf16.mxu1 %v2260_v50 }
 0x557   :  { %2263 = vmatpush3.bf16.msra.mxu1 %v2260_v50 }
 0x5ba   :  { %v2056_v10 = vpop.f32.mrb[4].mxu1 }
 0x5bb   :  { %v963_v47 = vpop.f32.mrb[5].mxu1 }
 0x5be   :  { %v2059_v48 = vpop.f32.mrb[6].mxu1 }
 0x5bf   :  { %v973_v33 = vpop.f32.mrb[7].mxu1 }
 0x60b   :  { %v2070_v51 = vpop.f32.mrb[16].mxu0 }
 0x60c   :  { %1315 = vrot.lane.b32.xlu1 %v2070_v51, %s2542_s1  ;;  %v1072_v46 = vpop.f32.mrb[17].mxu0 }
 0x60d   :  { %1313 = vrot.lane.b32.xlu0 %v1072_v46, %s2542_s1 }
 0x617   :  { %v2073_v54 = vpop.f32.mrb[18].mxu0 }
 0x618   :  { %v1082_v41 = vpop.f32.mrb[19].mxu0 }
 0x620   :  { %v2098_v52 = vpop.f32.mrb[20].mxu0 }
 0x621   :  { %v2084_v59 = vpop.f32.mrb[8].mxu1  ;;  %v1290_v38 = vpop.f32.mrb[21].mxu0 }
 0x622   :  { %1331 = vrot.lane.b32.xlu1 %v2084_v59, %s2543_s14  ;;  %v1181_v31 = vpop.f32.mrb[9].mxu1 }
 0x623   :  { %1329 = vrot.lane.b32.xlu0 %v1181_v31, %s2543_s14 }
 0x624   :  { %v2101_v60 = vpop.f32.mrb[22].mxu0 }
 0x625   :  { %v2087_v62 = vpop.f32.mrb[10].mxu1  ;;  %v1300_v27 = vpop.f32.mrb[23].mxu0 }
 0x626   :  { %1319 = vrot.lane.b32.xlu1 %v2073_v54, %s2542_s1  ;;  %v1191_v25 = vpop.f32.mrb[11].mxu1 }
 0x627   :  { %1317 = vrot.lane.b32.xlu0 %v1082_v41, %s2542_s1 }
 0x62a   :  { %1335 = vrot.lane.b32.xlu1 %v2087_v62, %s2543_s14 }
 0x62b   :  { %1333 = vrot.lane.b32.xlu0 %v1191_v25, %s2543_s14 }
 0x62e   :  { %1347 = vrot.lane.b32.xlu1 %v2098_v52, %s2544_s5 }
 0x62f   :  { %1345 = vrot.lane.b32.xlu0 %v1290_v38, %s2544_s5 }
 0x632   :  { %1351 = vrot.lane.b32.xlu1 %v2101_v60, %s2544_s5 }
 0x633   :  { %1349 = vrot.lane.b32.xlu0 %v1300_v27, %s2544_s5 }
 0x67e   :  { %v1316_v53 = vpop.permute.xlu1 %1315 }
 0x67f   :  { %v1314_v0 = vpop.permute.xlu0 %1313  ;;  %v1358_v61 = vsel %vm268_vm1, %v2056_v10, %v1316_v53  ;;  %v2486_v10 = vld [vmem:[%s3166_s0 + $0x10] sm:$0xff] }
 0x680   :  { %v1357_v6 = vsel %vm268_vm1, %v963_v47, %v1314_v0 }
 0x694   :  { %v1332_v1 = vpop.permute.xlu1 %1331 }
 0x695   :  { %v1330_v2 = vpop.permute.xlu0 %1329  ;;  %v1363_v63 = vsel %vm1361_vm3, %v1358_v61, %v1332_v1  ;;  %v1676_v61 = vld [vmem:[%s3174_s8] sm:$0xff] }
 0x696   :  { %v1362_v12 = vsel %vm1361_vm3, %v1357_v6, %v1330_v2  ;;  %v1551_v6 = vld [vmem:[%s3172_s6 + $0x18] sm:$0xff] }
 0x698   :  { %v1320_v55 = vpop.permute.xlu1 %1319 }
 0x699   :  { %v1318_v30 = vpop.permute.xlu0 %1317  ;;  %v1360_v3 = vsel %vm268_vm1, %v2059_v48, %v1320_v55  ;;  %v2487_v48 = vld [vmem:[%s3166_s0 + $0x18] sm:$0xff]  ;;  %v1548_v55 = vld [vmem:[%s3172_s6] sm:$0xff] }
 0x69a   :  { %v1359_v14 = vsel %vm268_vm1, %v973_v33, %v1318_v30  ;;  %v1549_v30 = vld [vmem:[%s3172_s6 + $0x8] sm:$0xff] }
 0x69c   :  { %v1336_v26 = vpop.permute.xlu1 %1335 }
 0x69d   :  { %v1334_v4 = vpop.permute.xlu0 %1333  ;;  %v1365_v17 = vsel %vm1361_vm3, %v1360_v3, %v1336_v26  ;;  %v2264_v26 = vpack.c.bf16 %v1549_v30, %v1548_v55  ;;  %v1690_v30 = vld [vmem:[%s3174_s8 + $0x70] sm:$0xff] }
 0x69e   :  { %v1364_v5 = vsel %vm1361_vm3, %v1359_v14, %v1334_v4  ;;  %v1550_v4 = vld [vmem:[%s3172_s6 + $0x10] sm:$0xff]  ;;  %v1680_v14 = vld [vmem:[%s3174_s8 + $0x20] sm:$0xff] }
 0x69f   :  { %2265 = vmatprep.subr.bf16.mxu0 %v2264_v26 }
 0x6a0   :  { %v1348_v8 = vpop.permute.xlu1 %1347  ;;  %2267 = vmatpush3.bf16.msra.mxu0 %v2264_v26  ;;  %v1691_v26 = vld [vmem:[%s3174_s8 + $0x78] sm:$0xff] }
 0x6a1   :  { %v1346_v13 = vpop.permute.xlu0 %1345  ;;  %v1368_v58 = vsel %vm1366_vm4, %v1363_v63, %v1348_v8  ;;  %v2268_v8 = vpack.c.bf16 %v1551_v6, %v1550_v4  ;;  %v2300_v4 = vpack.c.bf16 %v1691_v26, %v1690_v30  ;;  %v1863_v6 = vld [vmem:[%s3173_s7] ss:$0 sm:$0xff]  ;;  %s2545_s7 = smov [#allocation5]  }
 0x6a2   :  { %v1367_v49 = vsel %vm1366_vm4, %v1362_v12, %v1346_v13  ;;  %v1677_v12 = vld [vmem:[%s3174_s8 + $0x8] sm:$0xff]  ;;  %v1678_v13 = vld [vmem:[%s3174_s8 + $0x10] sm:$0xff] }
 0x6a3   :  { %2110 = vmatprep.mubr.msk.f32.mxu1 %vm50_vm0, %v1367_v49  ;;  %2269 = vmatprep.subr.bf16.mxu0 %v2268_v8  ;;  %v2272_v63 = vpack.c.bf16 %v1677_v12, %v1676_v61  ;;  %v1679_v49 = vld [vmem:[%s3174_s8 + $0x18] sm:$0xff] }
 0x6a4   :  { %v1352_v15 = vpop.permute.xlu1 %1351  ;;  %2111 = vmatmul.mubr.msk.f32.vlgmr.msra.gmra.mrb[12].mxu1 %vm50_vm0, %v1368_v58  ;;  %2271 = vmatpush3.bf16.msra.mxu0 %v2268_v8  ;;  %v2276_v58 = vpack.c.bf16 %v1679_v49, %v1678_v13 }
 0x6a5   :  { %v1350_v11 = vpop.permute.xlu0 %1349  ;;  %v1370_v20 = vsel %vm1366_vm4, %v1365_v17, %v1352_v15  ;;  %v1681_v15 = vld [vmem:[%s3174_s8 + $0x28] sm:$0xff]  ;;  %2273 = vmatprep.subr.bf16.mxu1 %v2272_v63 }
 0x6a6   :  { %v1369_v19 = vsel %vm1366_vm4, %v1364_v5, %v1350_v11  ;;  %2275 = vmatpush3.bf16.msra.mxu1 %v2272_v63  ;;  %v2280_v3 = vpack.c.bf16 %v1681_v15, %v1680_v14 }
 0x6a7   :  { %2113 = vmatprep.mubr.msk.f32.mxu1 %vm50_vm0, %v1369_v19  ;;  %2277 = vmatprep.subr.bf16.mxu1 %v2276_v58 }
 0x6a8   :  { %2114 = vmatmul.mubr.msk.f32.gmra.mrb[14].mxu1 %vm50_vm0, %v1370_v20 }
 0x6aa   :  { %2279 = vmatpush3.bf16.msra.mxu1 %v2276_v58 }
 0x6ab   :  { %2281 = vmatprep.subr.bf16.mxu1 %v2280_v3 }
 0x6ae   :  { %2283 = vmatpush3.bf16.msra.mxu1 %v2280_v3 }
 0x777   :  { %v2112_v24 = vpop.f32.mrb[12].mxu1 }
 0x778   :  { %v1463_v28 = vadd.f32 %v2112_v24, %v1378_v22  ;;  %v1457_v9 = vpop.f32.mrb[13].mxu1 }
 0x779   :  { %v1458_v18 = vadd.f32 %v1457_v9, %v1378_v22 }
 0x77a   :  { %v3019_v23 = vadd.f32 %v2484_v16, %v1463_v28 }
 0x77b   :  { %v3024_v34 = vadd.f32 %v2485_v32, %v1458_v18  ;;  %v2115_v35 = vpop.f32.mrb[14].mxu1  ;;  %v1534_v18 = vsub.s32 2, %v2641_v42 }
 0x77c   :  { %v1467_v36 = vpop.f32.mrb[15].mxu1  ;;  %v1483_v40 = vsel %vm50_vm0, %v3019_v23, 0.0  ;;  %v1473_v43 = vadd.f32 %v2115_v35, %v1378_v22  ;;  %v1542_v35 = vsub.s32 3, %v2641_v42 }
 0x77d   :  { %v1468_v37 = vadd.f32 %v1467_v36, %v1378_v22  ;;  %1484 = vadd.xlane.f32.xlu1 %v1483_v40  ;;  %v1480_v39 = vsel %vm50_vm0, %v3024_v34, 0.0  ;;  %v1535_v36 = vrot.slane %v3013_v7, %v1534_v18 }
 0x77e   :  { %1481 = vadd.xlane.f32.xlu0 %v1480_v39  ;;  %v3038_v33 = vadd.f32 %v2487_v48, %v1473_v43 }
 0x77f   :  { %v3033_v47 = vadd.f32 %v2486_v10, %v1468_v37  ;;  %v1543_v10 = vrot.slane %v3013_v7, %v1542_v35 }
 0x780   :  { %v1489_v46 = vsel %vm50_vm0, %v3038_v33, 0.0 }
 0x781   :  { %v1486_v51 = vsel %vm50_vm0, %v3033_v47, 0.0 }
 0x782   :  { %1487 = vadd.xlane.f32.xlu0 %v1486_v51 }
 0x786   :  { %1490 = vadd.xlane.f32.xlu0 %v1489_v46 }
 0x80a   :  { %v1485_v54 = vpop.xlane.xlu1 %1484 }
 0x80b   :  { %v1493_v41 = vmul.f32 0.03125, %v1485_v54  ;;  %v1482_v29 = vpop.xlane.xlu0 %1481 }
 0x80c   :  { %v1492_v45 = vmul.f32 0.03125, %v1482_v29 }
 0x80d   :  { %v3045_v56 = vsub.f32 %v3019_v23, %v1493_v41 }
 0x80e   :  { %v3048_v44 = vsub.f32 %v3024_v34, %v1492_v45 }
 0x80f   :  { %v1488_v57 = vpop.xlane.xlu0 %1487  ;;  %v1501_v50 = vmul.f32 %v3045_v56, %v3045_v56 }
 0x810   :  { %v1494_v52 = vmul.f32 0.03125, %v1488_v57  ;;  %v1500_v59 = vmul.f32 %v3048_v44, %v3048_v44 }
 0x811   :  { %v1507_v38 = vsel %vm50_vm0, %v1501_v50, 0.0 }
 0x812   :  { %v3056_v31 = vsub.f32 %v3033_v47, %v1494_v52  ;;  %1508 = vadd.xlane.f32.xlu1 %v1507_v38  ;;  %v1504_v60 = vsel %vm50_vm0, %v1500_v59, 0.0  ;;  %v1682_v59 = vld [vmem:[%s3174_s8 + $0x30] sm:$0xff]  ;;  %v1683_v38 = vld [vmem:[%s3174_s8 + $0x38] sm:$0xff] }
 0x813   :  { %1505 = vadd.xlane.f32.xlu0 %v1504_v60  ;;  %v1491_v62 = vpop.xlane.xlu0 %1490  ;;  %v1684_v60 = vld [vmem:[%s3174_s8 + $0x40] sm:$0xff] }
 0x814   :  { %v1495_v27 = vmul.f32 0.03125, %v1491_v62  ;;  %v1502_v25 = vmul.f32 %v3056_v31, %v3056_v31  ;;  %v1685_v62 = vld [vmem:[%s3174_s8 + $0x48] sm:$0xff] }
 0x816   :  { %v3062_v53 = vsub.f32 %v3038_v33, %v1495_v27  ;;  %v1510_v0 = vsel %vm50_vm0, %v1502_v25, 0.0  ;;  %v2288_v27 = vpack.c.bf16 %v1685_v62, %v1684_v60  ;;  %v1686_v25 = vld [vmem:[%s3174_s8 + $0x50] sm:$0xff] }
 0x817   :  { %1511 = vadd.xlane.f32.xlu0 %v1510_v0 }
 0x818   :  { %v1503_v1 = vmul.f32 %v3062_v53, %v3062_v53 }
 0x81a   :  { %v1513_v2 = vsel %vm50_vm0, %v1503_v1, 0.0  ;;  %v1688_v1 = vld [vmem:[%s3174_s8 + $0x60] sm:$0xff] }
 0x81b   :  { %1514 = vadd.xlane.f32.xlu1 %v1513_v2  ;;  %v1689_v2 = vld [vmem:[%s3174_s8 + $0x68] sm:$0xff] }
 0x81c   :  { %v2296_v55 = vpack.c.bf16 %v1689_v2, %v1688_v1 }
 0x89f   :  { %v1509_v5 = vpop.xlane.xlu1 %1508 }
 0x8a0   :  { %v1517_v11 = vmul.f32 0.03125, %v1509_v5  ;;  %v1506_v17 = vpop.xlane.xlu0 %1505 }
 0x8a1   :  { %v1516_v19 = vmul.f32 0.03125, %v1506_v17 }
 0x8a2   :  { %v1521_v20 = vadd.f32 1e-05, %v1517_v11 }
 0x8a3   :  { %v1520_v21 = vadd.f32 1e-05, %v1516_v19 }
 0x8a4   :  { %2467 = vrsqrt.f32 %v1521_v20  ;;  %v1512_v22 = vpop.xlane.xlu0 %1511 }
 0x8a5   :  { %2469 = vrsqrt.f32 %v1520_v21  ;;  %v1518_v24 = vmul.f32 0.03125, %v1512_v22 }
 0x8a7   :  { %v1522_v28 = vadd.f32 1e-05, %v1518_v24 }
 0x8a8   :  { %v1515_v9 = vpop.xlane.xlu1 %1514 }
 0x8a9   :  { %2471 = vrsqrt.f32 %v1522_v28  ;;  %v1519_v16 = vmul.f32 0.03125, %v1515_v9 }
 0x8ab   :  { %v1523_v32 = vadd.f32 1e-05, %v1519_v16 }
 0x8ad   :  { %2473 = vrsqrt.f32 %v1523_v32 }
 0x8ae   :  { %v2468_v40 = vpop.eup %2467 }
 0x8af   :  { %v2470_v43 = vpop.eup %2469  ;;  %v1529_v37 = vmul.f32 %v2468_v40, %v3045_v56 }
 0x8b0   :  { %v1528_v39 = vmul.f32 %v2470_v43, %v3048_v44 }
 0x8b1   :  { %v1537_v48 = vmul.f32 %v1535_v36, %v1529_v37 }
 0x8b2   :  { %v1536_v51 = vmul.f32 %v1535_v36, %v1528_v39  ;;  %v1694_v39 = vsub.s32 5, %v2641_v42 }
 0x8b3   :  { %v2472_v46 = vpop.eup %2471  ;;  %v1545_v29 = vadd.f32 %v1543_v10, %v1537_v48 }
 0x8b4   :  { %v1544_v54 = vadd.f32 %v1543_v10, %v1536_v51  ;;  %v1530_v41 = vmul.f32 %v2472_v46, %v3056_v31  ;;  %v2284_v31 = vpack.c.bf16 %v1683_v38, %v1682_v59 }
 0x8b6   :  { %2124 = vmatprep.mubr.msk.f32.mxu0 %vm50_vm0, %v1544_v54  ;;  %v1538_v45 = vmul.f32 %v1535_v36, %v1530_v41  ;;  %2285 = vmatprep.subr.bf16.mxu1 %v2284_v31 }
 0x8b7   :  { %v2474_v57 = vpop.eup %2473  ;;  %2125 = vmatmul.mubr.msk.f32.vlgmr.msra.gmra.mrb[24].mxu0 %vm50_vm0, %v1545_v29  ;;  %2287 = vmatpush3.bf16.msra.mxu1 %v2284_v31 }
 0x8b8   :  { %v1546_v50 = vadd.f32 %v1543_v10, %v1538_v45  ;;  %v1531_v56 = vmul.f32 %v2474_v57, %v3062_v53  ;;  %2289 = vmatprep.subr.bf16.mxu1 %v2288_v27  ;;  %v1687_v53 = vld [vmem:[%s3174_s8 + $0x58] sm:$0xff]  ;;  %s1794_s8 = sshll.u32 %s2545_s7, 4  ;;  %s1795_s8 = int_to_ptr.vmem [resolvable:$true] %s1794_s8 }
 0x8b9   :  { %v2292_v0 = vpack.c.bf16 %v1687_v53, %v1686_v25  ;;  %s2510_s13 = scalar_lea.vmem %s1795_s8, 512  ;;  %p2515_p9 = scmp.lt.s32.totalorder %s1795_s8, %s1795_s8 }
 0x8ba   :  { %2127 = vmatprep.mubr.msk.f32.mxu0 %vm50_vm0, %v1546_v50  ;;  %v1539_v44 = vmul.f32 %v1535_v36, %v1531_v56  ;;  %p2511_p8 = scmp.ne.s32.totalorder %s1795_s8, %s2510_s13  ;;  %p2516_p10 = scmp.lt.s32.totalorder %s2510_s13, %s2510_s13 }
 0x8bb   :  { %2291 = vmatpush3.bf16.msra.mxu1 %v2288_v27 }
 0x8bc   :  { %v1547_v52 = vadd.f32 %v1543_v10, %v1539_v44  ;;  %2293 = vmatprep.subr.bf16.mxu1 %v2292_v0  ;;  %v1695_v10 = vrot.slane %v3013_v7, %v1694_v39  ;;  %p2517_p11 = por %p2516_p10, %p2515_p9 }
 0x8be   :  { %2128 = vmatmul.mubr.msk.f32.gmra.mrb[26].mxu0 %vm50_vm0, %v1547_v52  ;;  %p2518_p12 = pnand %p2517_p11, %p2511_p8 }
 0x8bf   :  { %2295 = vmatpush3.bf16.msra.mxu1 %v2292_v0 }
 0x8c0   :  { %2297 = vmatprep.subr.bf16.mxu1 %v2296_v55 }
 0x8c3   :  { %2299 = vmatpush3.bf16.msra.mxu1 %v2296_v55 }
 0x8c4   :  { %2301 = vmatprep.subr.bf16.mxu1 %v2300_v4 }
 0x8c7   :  { %2303 = vmatpush3.bf16.msra.mxu1 %v2300_v4 }
 0x98a   :  { %v2126_v8 = vpop.f32.mrb[24].mxu0 }
 0x98b   :  { %v1643_v61 = vadd.f32 %v2126_v8, %v1863_v6  ;;  %v1637_v12 = vpop.f32.mrb[25].mxu0 }
 0x98c   :  { %v1638_v13 = vadd.f32 %v1863_v6, %v1637_v12 }
 0x98d   :  { %v1661_v63 = vmul.f32 0.70710677, %v1643_v61  ;;  %v1657_v24 = vmul.f32 0.5, %v1643_v61 }
 0x98e   :  { %v1660_v49 = vmul.f32 0.70710677, %v1638_v13  ;;  %v1656_v21 = vmul.f32 0.5, %v1638_v13 }
 0x98f   :  { %2475 = verf.f32 %v1661_v63 }
 0x990   :  { %2477 = verf.f32 %v1660_v49 }
 0x991   :  { %v2129_v58 = vpop.f32.mrb[26].mxu0 }
 0x992   :  { %v1653_v14 = vadd.f32 %v2129_v58, %v1863_v6  ;;  %v1647_v15 = vpop.f32.mrb[27].mxu0 }
 0x993   :  { %v1648_v3 = vadd.f32 %v1863_v6, %v1647_v15 }
 0x994   :  { %v1663_v5 = vmul.f32 0.70710677, %v1653_v14  ;;  %v1659_v40 = vmul.f32 0.5, %v1653_v14 }
 0x995   :  { %v1662_v11 = vmul.f32 0.70710677, %v1648_v3  ;;  %v1658_v35 = vmul.f32 0.5, %v1648_v3 }
 0x996   :  { %2479 = verf.f32 %v1663_v5 }
 0x997   :  { %2481 = verf.f32 %v1662_v11 }
 0x999   :  { %v2476_v17 = vpop.eup %2475 }
 0x99a   :  { %v2478_v19 = vpop.eup %2477  ;;  %v1669_v20 = vadd.f32 1.0, %v2476_v17 }
 0x99b   :  { %v1668_v22 = vadd.f32 1.0, %v2478_v19 }
 0x99c   :  { %v1673_v9 = vmul.f32 %v1669_v20, %v1657_v24 }
 0x99d   :  { %v1672_v28 = vmul.f32 %v1668_v22, %v1656_v21 }
 0x99f   :  { %2162 = vmatprep.mubr.f32.mxu1 %v1672_v28 }
 0x9a0   :  { %v2480_v18 = vpop.eup %2479  ;;  %2163 = vmatmul.mubr.f32.vlgmr.msra.gmra.mrb[16].mxu1 %v1673_v9 }
 0x9a1   :  { %v2482_v16 = vpop.eup %2481  ;;  %v1671_v32 = vadd.f32 1.0, %v2480_v18 }
 0x9a2   :  { %v1670_v36 = vadd.f32 1.0, %v2482_v16 }
 0x9a3   :  { %v1675_v37 = vmul.f32 %v1671_v32, %v1659_v40 }
 0x9a4   :  { %v1674_v43 = vmul.f32 %v1670_v36, %v1658_v35 }
 0x9a6   :  { %2165 = vmatprep.mubr.f32.mxu1 %v1674_v43 }
 0x9a7   :  { %2166 = vmatmul.mubr.f32.gmra.mrb[18].mxu1 %v1675_v37 }
 0xa73   :  { %v2164_v48 = vpop.f32.mrb[16].mxu1 }
 0xa74   :  { %v1768_v51 = vadd.f32 %v2164_v48, %v1695_v10  ;;  %v1762_v46 = vpop.f32.mrb[17].mxu1 }
 0xa75   :  { %v1763_v54 = vadd.f32 %v1762_v46, %v1695_v10 }
 0xa76   :  { %v1782_v41 = vadd.f32 %v1768_v51, %v3019_v23 }
 0xa77   :  { %v1781_v29 = vadd.f32 %v1763_v54, %v3024_v34 }
 0xa78   :  { %1786 = vst.msk [vmem:[#allocation5 + $0x8] sm:$0xff] %vm50_vm0, %v1782_v41 }
 0xa79   :  { %1785 = vst.msk [vmem:[#allocation5] sm:$0xff] %vm50_vm0, %v1781_v29 }
 0xa7a   :  { %v2167_v45 = vpop.f32.mrb[18].mxu1 }
 0xa7b   :  { %v1778_v57 = vadd.f32 %v2167_v45, %v1695_v10  ;;  %v1772_v50 = vpop.f32.mrb[19].mxu1 }
 0xa7c   :  { %v1773_v42 = vadd.f32 %v1772_v50, %v1695_v10 }
 0xa7d   :  { %v1784_v7 = vadd.f32 %v1778_v57, %v3038_v33 }
 0xa7e   :  { %v1783_v56 = vadd.f32 %v1773_v42, %v3033_v47 }
 0xa7f   :  { %1788 = vst.msk [vmem:[#allocation5 + $0x18] sm:$0xff] %vm50_vm0, %v1784_v7 }
 0xa80   :  { %1787 = vst.msk [vmem:[#allocation5 + $0x10] sm:$0xff] %vm50_vm0, %v1783_v56 }
 0xa81   :  { %2521 = shalt.err (!%p2518_p12)
}
 0xa82   :  { %s2522_s5 = scalar_lea.hbm %s3175_s9, 512 }
 0xa83   :  { %p2523_p13 = scmp.ne.s32.totalorder %s3175_s9, %s2522_s5  ;;  %p2526_p0 = scmp.lt.u32.totalorder %s2522_s5, %s3175_s9 }
 0xa85   :  { %p2528_p1 = pnand %p2526_p0, %p2523_p13 }
 0xa87   :  { %2531 = shalt.err (!%p2528_p1)
}
 0xa88   :  { %s2546_s4 = smov 128  }
 0xa89   :  { %1800 = dma.vmem_to_hbm [thread:$0]  %s1795_s8, 512, %s3175_s9, [#allocation4], %s2546_s4, %s2546_s4, %s2542_s1  }
 0xa8a   :  { %2534 = dma.done.wait [#allocation4], 512  }
 0xa8b   :  { %2535 = vsyncadd [#allocation4], 4294966784 }
 0xa8c   :  { %1804 = vsyncpa [#allocation3], 1 }
 0xa8d   :  { %1805 = vsyncpa [#allocation4], 1 }

</bundles_post_ra>
